<compile_context>
chip_gen: v5e
topology: v5e:2x2
jax: 0.10.0
libtpu: 0.0.40
codegen_flags: <defaults>
</compile_context>

<pallas_src>
import functools

import jax
import jax.numpy as jnp
import numpy as np
from jax.experimental import pallas as pl
from jax.experimental.pallas import tpu as pltpu

# ------------------------- model hyper-parameters (small) -------------------------
CONTEXT_LENGTH = 8
WIDTH = 64
LAYERS = 2
VOCAB_SIZE = 32
HEADS = max(1, WIDTH // 64)          # = 1 for width=64 (matches `heads = width // 64`)
HEAD_DIM = WIDTH // HEADS
BATCH = 2
NEG_INF = -1e30                      # softmax-safe stand-in for float('-inf')
MXU_DTYPE = jnp.float32              # bf16 hook for v6e/v7x at scale (LN/softmax stay f32)

# Row indices inside the consolidated per-layer vector slab (LAYERS, 9, W).
_LN1W, _LN1B, _BQ, _BK, _BV, _BO, _LN2W, _LN2B, _BPR = range(9)


# --------------------------------- kernel helpers ---------------------------------
def _layernorm(x, w, b, eps=1e-5):
    mu = jnp.mean(x, axis=-1, keepdims=True)
    var = jnp.mean((x - mu) ** 2, axis=-1, keepdims=True)
    return (x - mu) * jax.lax.rsqrt(var + eps) * w + b


def _dense(x, w, b):
    # x: (L, in), w: (in, out) [pre-transposed on host], b: (1, out) -> native MXU dot.
    return jnp.dot(x.astype(MXU_DTYPE), w.astype(MXU_DTYPE),
                   preferred_element_type=jnp.float32) + b


def _quick_gelu(x):
    return x * jax.nn.sigmoid(1.702 * x)


# ----------------- fused text-encoder kernel (embed + all layers + ln_final + gather) -----------------
def text_encoder_kernel(text_sref, eot_sref,                       # scalar-prefetch (SMEM)
                        emb_ref, pos_ref, vec_ref, bfc_ref,
                        wq_ref, wk_ref, wv_ref, wo_ref, wfc_ref, wpr_ref,
                        lnf_ref,
                        out_ref, x_scr, *, num_heads, num_layers, seq_len):
    L = seq_len
    W = x_scr.shape[-1]
    Dh = W // num_heads
    b = pl.program_id(0)

    # ---- fused embedding gather + positional add (former XLA glue) ----
    for i in range(L):                                   # static: L = 8 rows
        tok = text_sref[b, i]                            # SMEM scalar read
        x_scr[pl.ds(i, 1), :] = emb_ref[pl.ds(tok, 1), :] + pos_ref[pl.ds(i, 1), :]

    # Causal additive mask built in-kernel (hoisted out of the layer loop): -inf strictly
    # above the diagonal, zeros on/below — identical to fill(-inf).triu_(1).
    row = jax.lax.broadcasted_iota(jnp.int32, (L, L), 0)
    col = jax.lax.broadcasted_iota(jnp.int32, (L, L), 1)
    neg = jnp.where(col > row, jnp.float32(NEG_INF), jnp.float32(0.0))

    x = x_scr[...].astype(jnp.float32)                   # (L, W) — resident across all layers

    for l in range(num_layers):                          # static unroll; weights VMEM-resident
        vl = vec_ref[l]                                  # (9, W) consolidated small params

        # ---- attention branch: h = ln_1(x); causal MHA(h, h, h) ----
        h = _layernorm(x, vl[_LN1W:_LN1W + 1], vl[_LN1B:_LN1B + 1])
        q = _dense(h, wq_ref[l], vl[_BQ:_BQ + 1])        # 1/sqrt(Dh) folded into wq/bq
        k = _dense(h, wk_ref[l], vl[_BK:_BK + 1])
        v = _dense(h, wv_ref[l], vl[_BV:_BV + 1])

        if num_heads == 1:
            s = jnp.einsum("qd,kd->qk", q, k, preferred_element_type=jnp.float32) + neg
            s = s - jnp.max(s, axis=-1, keepdims=True)
            p = jnp.exp(s)
            p = p / jnp.sum(p, axis=-1, keepdims=True)   # exact softmax (correctness fix)
            ctx = jnp.dot(p.astype(MXU_DTYPE), v.astype(MXU_DTYPE),
                          preferred_element_type=jnp.float32)
        else:
            q4 = q.reshape(L, num_heads, Dh)
            k4 = k.reshape(L, num_heads, Dh)
            v4 = v.reshape(L, num_heads, Dh)
            s = jnp.einsum("qhd,khd->hqk", q4, k4, preferred_element_type=jnp.float32)
            s = s + neg[None]
            s = s - jnp.max(s, axis=-1, keepdims=True)
            p = jnp.exp(s)
            p = p / jnp.sum(p, axis=-1, keepdims=True)
            ctx = jnp.einsum("hqk,khd->qhd", p, v4,
                             preferred_element_type=jnp.float32).reshape(L, W)

        x = x + _dense(ctx, wo_ref[l], vl[_BO:_BO + 1])

        # ---- MLP branch: x = x + c_proj(QuickGELU(c_fc(ln_2(x)))) ----
        g = _layernorm(x, vl[_LN2W:_LN2W + 1], vl[_LN2B:_LN2B + 1])
        fc = _quick_gelu(_dense(g, wfc_ref[l], bfc_ref[l]))
        x = x + _dense(fc, wpr_ref[l], vl[_BPR:_BPR + 1])

    # ---- fused ln_final + eot-token gather (text_x = x[b, argmax(text[b])]) ----
    x_scr[...] = _layernorm(x, lnf_ref[0:1, :], lnf_ref[1:2, :])
    eot = eot_sref[b]
    out_ref[...] = x_scr[pl.ds(eot, 1), :].astype(out_ref.dtype)


# ------------------------------------ wrappers ------------------------------------
_PACKED_ORDER = ("emb", "pos", "vec", "bfc", "wq", "wk", "wv", "wo", "wfc", "wpr", "lnf")


def pack_params(params):
    """Host-side, one-time: stack/consolidate per-layer params, transpose Linear weights to
    (in, out), and fold the 1/sqrt(Dh) attention scale into wq/bq."""
    W = WIDTH
    scale = float(HEAD_DIM) ** (-0.5)

    vec_rows, bfc_rows = [], []
    wq, wk, wv, wo, wfc, wpr = [], [], [], [], [], []
    for lp in params["layers"]:
        bq = lp["in_proj_b"][:, 0 * W:1 * W] * scale
        bk = lp["in_proj_b"][:, 1 * W:2 * W]
        bv = lp["in_proj_b"][:, 2 * W:3 * W]
        # Consolidated (9, W) slab of all small per-layer vectors -> one DMA instead of nine.
        vec_rows.append(jnp.concatenate(
            [lp["ln1_w"], lp["ln1_b"], bq, bk, bv, lp["out_proj_b"],
             lp["ln2_w"], lp["ln2_b"], lp["c_proj_b"]], axis=0))
        bfc_rows.append(lp["c_fc_b"])                               # (1, 4W)
        wq.append(lp["in_proj_w"][0 * W:1 * W].T * scale)           # (W, W), scale folded in
        wk.append(lp["in_proj_w"][1 * W:2 * W].T)
        wv.append(lp["in_proj_w"][2 * W:3 * W].T)
        wo.append(lp["out_proj_w"].T)
        wfc.append(lp["c_fc_w"].T)                                  # (W, 4W)
        wpr.append(lp["c_proj_w"].T)                                # (4W, W)

    packed = {
        "emb": params["token_embedding"],                           # (VOCAB, W)
        "pos": params["positional_embedding"],                      # (L, W)
        "vec": jnp.stack(vec_rows, 0),                              # (LAYERS, 9, W)
        "bfc": jnp.stack(bfc_rows, 0),                              # (LAYERS, 1, 4W)
        "wq": jnp.stack(wq, 0).astype(MXU_DTYPE),
        "wk": jnp.stack(wk, 0).astype(MXU_DTYPE),
        "wv": jnp.stack(wv, 0).astype(MXU_DTYPE),
        "wo": jnp.stack(wo, 0).astype(MXU_DTYPE),
        "wfc": jnp.stack(wfc, 0).astype(MXU_DTYPE),
        "wpr": jnp.stack(wpr, 0).astype(MXU_DTYPE),
        "lnf": jnp.concatenate([params["lnf_w"], params["lnf_b"]], axis=0),   # (2, W)
    }
    return packed


def text_encoder_pallas(text, eot, packed):
    B, L = text.shape
    W = WIDTH
    operands = [packed[name] for name in _PACKED_ORDER]

    def full_spec(arr):
        # Constant block index -> each weight slab is DMA'd to VMEM once, reused across grid.
        return pl.BlockSpec(arr.shape, lambda b, *_: (0,) * arr.ndim)

    in_specs = [full_spec(a) for a in operands]
    out_spec = pl.BlockSpec((None, 1, W), lambda b, *_: (b, 0, 0))   # batch squeezed

    flops = B * (LAYERS * (24 * L * W * W + 4 * L * L * W) + 2 * L * W)
    transcendentals = B * LAYERS * (L * L + 4 * L * W)
    bytes_accessed = (text.size * 4 + eot.size * 4 + B * W * 4
                      + sum(int(a.size) * a.dtype.itemsize for a in operands))

    # NOTE: grid=(B,) "parallel" keeps both v7x TensorCores busy; on single-TC v5e/v6e the
    # extra serial grid step costs ~0.35 us (fold B into M there if it ever matters).
    out = pl.pallas_call(
        functools.partial(text_encoder_kernel, num_heads=HEADS, num_layers=LAYERS, seq_len=L),
        grid_spec=pltpu.PrefetchScalarGridSpec(
            num_scalar_prefetch=2,                                   # token ids + eot indices
            grid=(B,),
            in_specs=in_specs,
            out_specs=out_spec,
            scratch_shapes=[pltpu.VMEM((L, W), jnp.float32)],
        ),
        out_shape=jax.ShapeDtypeStruct((B, 1, W), jnp.float32),
        compiler_params=pltpu.CompilerParams(dimension_semantics=("parallel",)),
        cost_estimate=pl.CostEstimate(flops=flops,
                                      transcendentals=transcendentals,
                                      bytes_accessed=bytes_accessed),
    )(text, eot, *operands)
    return out[:, 0, :]                                              # (B, W)


def text_transformer_forward(text, packed):
    # The only remaining glue is the tiny (B, L) int argmax; everything else (embedding
    # gather, pos add, all blocks, ln_final, eot gather) runs inside one pallas_call.
    text = text.astype(jnp.int32)
    eot = jnp.argmax(text, axis=-1).astype(jnp.int32)
    return text_encoder_pallas(text, eot, packed)                    # (B, W)


def build_attention_mask(L):
    # fill(-inf).triu_(1): zeros on/below diagonal, -inf strictly above (for the reference).
    return jnp.triu(jnp.full((L, L), NEG_INF, dtype=jnp.float32), k=1)


# ------------------------------ pure-JAX reference ------------------------------
def _ref_block(x, lp, mask, num_heads):
    B, L, W = x.shape
    Dh = W // num_heads
    h = _layernorm(x, lp["ln1_w"], lp["ln1_b"])
    qkv = jnp.einsum("bli,oi->blo", h, lp["in_proj_w"]) + lp["in_proj_b"]
    q, k, v = qkv[..., :W], qkv[..., W:2 * W], qkv[..., 2 * W:]
    q = q.reshape(B, L, num_heads, Dh).transpose(0, 2, 1, 3) / float(Dh) ** 0.5
    k = k.reshape(B, L, num_heads, Dh).transpose(0, 2, 1, 3)
    v = v.reshape(B, L, num_heads, Dh).transpose(0, 2, 1, 3)
    s = jnp.einsum("bhqd,bhkd->bhqk", q, k) + mask
    p = jax.nn.softmax(s, axis=-1)
    ctx = jnp.einsum("bhqk,bhkd->bhqd", p, v).transpose(0, 2, 1, 3).reshape(B, L, W)
    attn_out = jnp.einsum("bli,oi->blo", ctx, lp["out_proj_w"]) + lp["out_proj_b"]
    x = x + attn_out
    g = _layernorm(x, lp["ln2_w"], lp["ln2_b"])
    fc = _quick_gelu(jnp.einsum("bli,oi->blo", g, lp["c_fc_w"]) + lp["c_fc_b"])
    return x + jnp.einsum("bli,oi->blo", fc, lp["c_proj_w"]) + lp["c_proj_b"]


def ref_forward(text, params):
    B, L = text.shape
    x = params["token_embedding"][text] + params["positional_embedding"]
    mask = build_attention_mask(L)
    for lp in params["layers"]:
        x = _ref_block(x, lp, mask, HEADS)
    x = _layernorm(x, params["lnf_w"], params["lnf_b"])
    return x[jnp.arange(B), jnp.argmax(text, axis=-1)]


# --------------------------------- parameter init ---------------------------------
def init_params(key):
    W, L4 = WIDTH, 4 * WIDTH
    proj_std = WIDTH ** (-0.5) * (2 * LAYERS) ** (-0.5)
    attn_std = WIDTH ** (-0.5)
    fc_std = (2 * WIDTH) ** (-0.5)

    keys = jax.random.split(key, 2 + 6 * LAYERS)
    params = {
        "token_embedding": 0.02 * jax.random.normal(keys[0], (VOCAB_SIZE, W), jnp.float32),
        "positional_embedding": 0.01 * jax.random.normal(keys[1], (CONTEXT_LENGTH, W), jnp.float32),
        "lnf_w": jnp.ones((1, W), jnp.float32),
        "lnf_b": jnp.zeros((1, W), jnp.float32),
        "layers": [],
    }
    for i in range(LAYERS):
        k = keys[2 + 6 * i: 2 + 6 * (i + 1)]
        params["layers"].append({
            "ln1_w": jnp.ones((1, W), jnp.float32),
            "ln1_b": jnp.zeros((1, W), jnp.float32),
            "in_proj_w": attn_std * jax.random.normal(k[0], (3 * W, W), jnp.float32),
            "in_proj_b": jnp.zeros((1, 3 * W), jnp.float32),
            "out_proj_w": proj_std * jax.random.normal(k[1], (W, W), jnp.float32),
            "out_proj_b": jnp.zeros((1, W), jnp.float32),
            "ln2_w": jnp.ones((1, W), jnp.float32),
            "ln2_b": jnp.zeros((1, W), jnp.float32),
            "c_fc_w": fc_std * jax.random.normal(k[2], (L4, W), jnp.float32),
            "c_fc_b": 0.01 * jax.random.normal(k[3], (1, L4), jnp.float32),
            "c_proj_w": proj_std * jax.random.normal(k[4], (W, L4), jnp.float32),
            "c_proj_b": 0.01 * jax.random.normal(k[5], (1, W), jnp.float32),
        })
    return params


# -------------------------------------- main --------------------------------------
if __name__ == "__main__":
    key = jax.random.PRNGKey(0)
    pkey, tkey = jax.random.split(key)
    params = init_params(pkey)
    packed = pack_params(params)   # one-time host-side weight transpose/stack/fold

    text = jax.random.randint(tkey, (BATCH, CONTEXT_LENGTH), 0, VOCAB_SIZE, dtype=jnp.int32)

    forward = jax.jit(text_transformer_forward)
    text_x = jax.block_until_ready(forward(text, packed))
    ref = jax.block_until_ready(ref_forward(text, params))

    assert text_x.shape == (BATCH, WIDTH), text_x.shape
    np.testing.assert_allclose(np.asarray(text_x), np.asarray(ref), atol=1e-3, rtol=1e-3)
    print("KERNEL_OK")
</pallas_src>

<mosaic_0001>
module attributes {stable_mosaic.version = 11 : i64} {
  func.func @text_encoder_kernel(%arg0: i32, %arg1: memref<2x8xi32, #tpu.memory_space<smem>>, %arg2: memref<2xi32, #tpu.memory_space<smem>>, %arg3: memref<32x64xf32, #tpu.memory_space<vmem>>, %arg4: memref<8x64xf32, #tpu.memory_space<vmem>>, %arg5: memref<2x9x64xf32, #tpu.memory_space<vmem>>, %arg6: memref<2x1x256xf32, #tpu.memory_space<vmem>>, %arg7: memref<2x64x64xf32, #tpu.memory_space<vmem>>, %arg8: memref<2x64x64xf32, #tpu.memory_space<vmem>>, %arg9: memref<2x64x64xf32, #tpu.memory_space<vmem>>, %arg10: memref<2x64x64xf32, #tpu.memory_space<vmem>>, %arg11: memref<2x64x256xf32, #tpu.memory_space<vmem>>, %arg12: memref<2x256x64xf32, #tpu.memory_space<vmem>>, %arg13: memref<2x64xf32, #tpu.memory_space<vmem>>, %arg14: memref<1x1x64xf32, #tpu.memory_space<vmem>>, %arg15: memref<8x64xf32, #tpu.memory_space<vmem>>) attributes {dimension_semantics = [#tpu.dimension_semantics<parallel>], iteration_bounds = array<i64: 2>, scalar_prefetch = 2 : i64, scratch_operands = 1 : i64, tpu.core_type = #tpu.core_type<tc>, window_params = [{pipeline_mode = #tpu.pipeline_mode<synchronous>, transform_indices = @transform_0, window_bounds = array<i64: 32, 64>}, {pipeline_mode = #tpu.pipeline_mode<synchronous>, transform_indices = @transform_1, window_bounds = array<i64: 8, 64>}, {pipeline_mode = #tpu.pipeline_mode<synchronous>, transform_indices = @transform_2, window_bounds = array<i64: 2, 9, 64>}, {pipeline_mode = #tpu.pipeline_mode<synchronous>, transform_indices = @transform_3, window_bounds = array<i64: 2, 1, 256>}, {pipeline_mode = #tpu.pipeline_mode<synchronous>, transform_indices = @transform_4, window_bounds = array<i64: 2, 64, 64>}, {pipeline_mode = #tpu.pipeline_mode<synchronous>, transform_indices = @transform_5, window_bounds = array<i64: 2, 64, 64>}, {pipeline_mode = #tpu.pipeline_mode<synchronous>, transform_indices = @transform_6, window_bounds = array<i64: 2, 64, 64>}, {pipeline_mode = #tpu.pipeline_mode<synchronous>, transform_indices = @transform_7, window_bounds = array<i64: 2, 64, 64>}, {pipeline_mode = #tpu.pipeline_mode<synchronous>, transform_indices = @transform_8, window_bounds = array<i64: 2, 64, 256>}, {pipeline_mode = #tpu.pipeline_mode<synchronous>, transform_indices = @transform_9, window_bounds = array<i64: 2, 256, 64>}, {pipeline_mode = #tpu.pipeline_mode<synchronous>, transform_indices = @transform_10, window_bounds = array<i64: 2, 64>}, {transform_indices = @transform_11, window_bounds = array<i64: 1, 1, 64>}]} {
    %0 = arith.index_cast %arg0 : i32 to index
    %c0 = arith.constant 0 : index
    %1 = memref.load %arg1[%0, %c0] : memref<2x8xi32, #tpu.memory_space<smem>>
    %2 = arith.index_cast %1 : i32 to index
    %c0_0 = arith.constant 0 : index
    %3 = vector.load %arg3[%2, %c0_0] : memref<32x64xf32, #tpu.memory_space<vmem>>, vector<1x64xf32>
    %c0_1 = arith.constant 0 : index
    %c0_2 = arith.constant 0 : index
    %4 = vector.load %arg4[%c0_1, %c0_2] : memref<8x64xf32, #tpu.memory_space<vmem>>, vector<1x64xf32>
    %5 = arith.addf %3, %4 : vector<1x64xf32>
    %c0_3 = arith.constant 0 : index
    %c0_4 = arith.constant 0 : index
    %6 = vector.load %arg15[%c0_3, %c0_4] : memref<8x64xf32, #tpu.memory_space<vmem>>, vector<1x64xf32>
    tpu.vector_store %arg15[%c0_3, %c0_4], %5 {strides = array<i32>} : memref<8x64xf32, #tpu.memory_space<vmem>>, vector<1x64xf32>,
    %7 = arith.index_cast %arg0 : i32 to index
    %c1 = arith.constant 1 : index
    %8 = memref.load %arg1[%7, %c1] : memref<2x8xi32, #tpu.memory_space<smem>>
    %9 = arith.index_cast %8 : i32 to index
    %c0_5 = arith.constant 0 : index
    %10 = vector.load %arg3[%9, %c0_5] : memref<32x64xf32, #tpu.memory_space<vmem>>, vector<1x64xf32>
    %c1_6 = arith.constant 1 : index
    %c0_7 = arith.constant 0 : index
    %11 = vector.load %arg4[%c1_6, %c0_7] : memref<8x64xf32, #tpu.memory_space<vmem>>, vector<1x64xf32>
    %12 = arith.addf %10, %11 : vector<1x64xf32>
    %c1_8 = arith.constant 1 : index
    %c0_9 = arith.constant 0 : index
    %13 = vector.load %arg15[%c1_8, %c0_9] : memref<8x64xf32, #tpu.memory_space<vmem>>, vector<1x64xf32>
    tpu.vector_store %arg15[%c1_8, %c0_9], %12 {strides = array<i32>} : memref<8x64xf32, #tpu.memory_space<vmem>>, vector<1x64xf32>,
    %14 = arith.index_cast %arg0 : i32 to index
    %c2 = arith.constant 2 : index
    %15 = memref.load %arg1[%14, %c2] : memref<2x8xi32, #tpu.memory_space<smem>>
    %16 = arith.index_cast %15 : i32 to index
    %c0_10 = arith.constant 0 : index
    %17 = vector.load %arg3[%16, %c0_10] : memref<32x64xf32, #tpu.memory_space<vmem>>, vector<1x64xf32>
    %c2_11 = arith.constant 2 : index
    %c0_12 = arith.constant 0 : index
    %18 = vector.load %arg4[%c2_11, %c0_12] : memref<8x64xf32, #tpu.memory_space<vmem>>, vector<1x64xf32>
    %19 = arith.addf %17, %18 : vector<1x64xf32>
    %c2_13 = arith.constant 2 : index
    %c0_14 = arith.constant 0 : index
    %20 = vector.load %arg15[%c2_13, %c0_14] : memref<8x64xf32, #tpu.memory_space<vmem>>, vector<1x64xf32>
    tpu.vector_store %arg15[%c2_13, %c0_14], %19 {strides = array<i32>} : memref<8x64xf32, #tpu.memory_space<vmem>>, vector<1x64xf32>,
    %21 = arith.index_cast %arg0 : i32 to index
    %c3 = arith.constant 3 : index
    %22 = memref.load %arg1[%21, %c3] : memref<2x8xi32, #tpu.memory_space<smem>>
    %23 = arith.index_cast %22 : i32 to index
    %c0_15 = arith.constant 0 : index
    %24 = vector.load %arg3[%23, %c0_15] : memref<32x64xf32, #tpu.memory_space<vmem>>, vector<1x64xf32>
    %c3_16 = arith.constant 3 : index
    %c0_17 = arith.constant 0 : index
    %25 = vector.load %arg4[%c3_16, %c0_17] : memref<8x64xf32, #tpu.memory_space<vmem>>, vector<1x64xf32>
    %26 = arith.addf %24, %25 : vector<1x64xf32>
    %c3_18 = arith.constant 3 : index
    %c0_19 = arith.constant 0 : index
    %27 = vector.load %arg15[%c3_18, %c0_19] : memref<8x64xf32, #tpu.memory_space<vmem>>, vector<1x64xf32>
    tpu.vector_store %arg15[%c3_18, %c0_19], %26 {strides = array<i32>} : memref<8x64xf32, #tpu.memory_space<vmem>>, vector<1x64xf32>,
    %28 = arith.index_cast %arg0 : i32 to index
    %c4 = arith.constant 4 : index
    %29 = memref.load %arg1[%28, %c4] : memref<2x8xi32, #tpu.memory_space<smem>>
    %30 = arith.index_cast %29 : i32 to index
    %c0_20 = arith.constant 0 : index
    %31 = vector.load %arg3[%30, %c0_20] : memref<32x64xf32, #tpu.memory_space<vmem>>, vector<1x64xf32>
    %c4_21 = arith.constant 4 : index
    %c0_22 = arith.constant 0 : index
    %32 = vector.load %arg4[%c4_21, %c0_22] : memref<8x64xf32, #tpu.memory_space<vmem>>, vector<1x64xf32>
    %33 = arith.addf %31, %32 : vector<1x64xf32>
    %c4_23 = arith.constant 4 : index
    %c0_24 = arith.constant 0 : index
    %34 = vector.load %arg15[%c4_23, %c0_24] : memref<8x64xf32, #tpu.memory_space<vmem>>, vector<1x64xf32>
    tpu.vector_store %arg15[%c4_23, %c0_24], %33 {strides = array<i32>} : memref<8x64xf32, #tpu.memory_space<vmem>>, vector<1x64xf32>,
    %35 = arith.index_cast %arg0 : i32 to index
    %c5 = arith.constant 5 : index
    %36 = memref.load %arg1[%35, %c5] : memref<2x8xi32, #tpu.memory_space<smem>>
    %37 = arith.index_cast %36 : i32 to index
    %c0_25 = arith.constant 0 : index
    %38 = vector.load %arg3[%37, %c0_25] : memref<32x64xf32, #tpu.memory_space<vmem>>, vector<1x64xf32>
    %c5_26 = arith.constant 5 : index
    %c0_27 = arith.constant 0 : index
    %39 = vector.load %arg4[%c5_26, %c0_27] : memref<8x64xf32, #tpu.memory_space<vmem>>, vector<1x64xf32>
    %40 = arith.addf %38, %39 : vector<1x64xf32>
    %c5_28 = arith.constant 5 : index
    %c0_29 = arith.constant 0 : index
    %41 = vector.load %arg15[%c5_28, %c0_29] : memref<8x64xf32, #tpu.memory_space<vmem>>, vector<1x64xf32>
    tpu.vector_store %arg15[%c5_28, %c0_29], %40 {strides = array<i32>} : memref<8x64xf32, #tpu.memory_space<vmem>>, vector<1x64xf32>,
    %42 = arith.index_cast %arg0 : i32 to index
    %c6 = arith.constant 6 : index
    %43 = memref.load %arg1[%42, %c6] : memref<2x8xi32, #tpu.memory_space<smem>>
    %44 = arith.index_cast %43 : i32 to index
    %c0_30 = arith.constant 0 : index
    %45 = vector.load %arg3[%44, %c0_30] : memref<32x64xf32, #tpu.memory_space<vmem>>, vector<1x64xf32>
    %c6_31 = arith.constant 6 : index
    %c0_32 = arith.constant 0 : index
    %46 = vector.load %arg4[%c6_31, %c0_32] : memref<8x64xf32, #tpu.memory_space<vmem>>, vector<1x64xf32>
    %47 = arith.addf %45, %46 : vector<1x64xf32>
    %c6_33 = arith.constant 6 : index
    %c0_34 = arith.constant 0 : index
    %48 = vector.load %arg15[%c6_33, %c0_34] : memref<8x64xf32, #tpu.memory_space<vmem>>, vector<1x64xf32>
    tpu.vector_store %arg15[%c6_33, %c0_34], %47 {strides = array<i32>} : memref<8x64xf32, #tpu.memory_space<vmem>>, vector<1x64xf32>,
    %49 = arith.index_cast %arg0 : i32 to index
    %c7 = arith.constant 7 : index
    %50 = memref.load %arg1[%49, %c7] : memref<2x8xi32, #tpu.memory_space<smem>>
    %51 = arith.index_cast %50 : i32 to index
    %c0_35 = arith.constant 0 : index
    %52 = vector.load %arg3[%51, %c0_35] : memref<32x64xf32, #tpu.memory_space<vmem>>, vector<1x64xf32>
    %c7_36 = arith.constant 7 : index
    %c0_37 = arith.constant 0 : index
    %53 = vector.load %arg4[%c7_36, %c0_37] : memref<8x64xf32, #tpu.memory_space<vmem>>, vector<1x64xf32>
    %54 = arith.addf %52, %53 : vector<1x64xf32>
    %c7_38 = arith.constant 7 : index
    %c0_39 = arith.constant 0 : index
    %55 = vector.load %arg15[%c7_38, %c0_39] : memref<8x64xf32, #tpu.memory_space<vmem>>, vector<1x64xf32>
    tpu.vector_store %arg15[%c7_38, %c0_39], %54 {strides = array<i32>} : memref<8x64xf32, #tpu.memory_space<vmem>>, vector<1x64xf32>,
    %56 = tpu.iota {dimensions = array<i32: 0>} : vector<8x8xi32>
    %57 = tpu.iota {dimensions = array<i32: 1>} : vector<8x8xi32>
    %58 = arith.cmpi sgt, %57, %56 : vector<8x8xi32>
    %cst = arith.constant -1.000000e+30 : f32
    %cst_40 = arith.constant 0.000000e+00 : f32
    %59 = vector.broadcast %cst : f32 to vector<8x8xf32>
    %60 = vector.broadcast %cst_40 : f32 to vector<8x8xf32>
    %61 = arith.select %58, %59, %60 : vector<8x8xi1>, vector<8x8xf32>
    %c0_41 = arith.constant 0 : index
    %c0_42 = arith.constant 0 : index
    %62 = vector.load %arg15[%c0_41, %c0_42] : memref<8x64xf32, #tpu.memory_space<vmem>>, vector<8x64xf32>
    %c0_43 = arith.constant 0 : index
    %c0_44 = arith.constant 0 : index
    %c0_45 = arith.constant 0 : index
    %63 = vector.load %arg5[%c0_43, %c0_44, %c0_45] : memref<2x9x64xf32, #tpu.memory_space<vmem>>, vector<1x9x64xf32>
    %64 = vector.shape_cast %63 : vector<1x9x64xf32> to vector<9x64xf32>
    %65 = vector.extract_strided_slice %64 {offsets = [0, 0], sizes = [1, 64], strides = [1, 1]} : vector<9x64xf32> to vector<1x64xf32>
    %66 = vector.extract_strided_slice %64 {offsets = [1, 0], sizes = [1, 64], strides = [1, 1]} : vector<9x64xf32> to vector<1x64xf32>
    %cst_46 = arith.constant dense<0.000000e+00> : vector<8xf32>
    %67 = vector.multi_reduction <add>, %62, %cst_46 [1] : vector<8x64xf32> to vector<8xf32>
    %68 = vector.shape_cast %67 : vector<8xf32> to vector<8x1xf32>
    %cst_47 = arith.constant 6.400000e+01 : f32
    %69 = vector.broadcast %cst_47 : f32 to vector<8x1xf32>
    %70 = arith.divf %68, %69 : vector<8x1xf32>
    %71 = vector.broadcast %70 : vector<8x1xf32> to vector<8x64xf32>
    %72 = arith.subf %62, %71 : vector<8x64xf32>
    %73 = arith.mulf %72, %72 : vector<8x64xf32>
    %cst_48 = arith.constant dense<0.000000e+00> : vector<8xf32>
    %74 = vector.multi_reduction <add>, %73, %cst_48 [1] : vector<8x64xf32> to vector<8xf32>
    %75 = vector.shape_cast %74 : vector<8xf32> to vector<8x1xf32>
    %cst_49 = arith.constant 6.400000e+01 : f32
    %76 = vector.broadcast %cst_49 : f32 to vector<8x1xf32>
    %77 = arith.divf %75, %76 : vector<8x1xf32>
    %78 = vector.broadcast %70 : vector<8x1xf32> to vector<8x64xf32>
    %79 = arith.subf %62, %78 : vector<8x64xf32>
    %cst_50 = arith.constant 9.99999974E-6 : f32
    %80 = vector.broadcast %cst_50 : f32 to vector<8x1xf32>
    %81 = arith.addf %77, %80 : vector<8x1xf32>
    %82 = math.rsqrt %81 : vector<8x1xf32>
    %83 = vector.broadcast %82 : vector<8x1xf32> to vector<8x64xf32>
    %84 = arith.mulf %79, %83 : vector<8x64xf32>
    %85 = vector.broadcast %65 : vector<1x64xf32> to vector<8x64xf32>
    %86 = arith.mulf %84, %85 : vector<8x64xf32>
    %87 = vector.broadcast %66 : vector<1x64xf32> to vector<8x64xf32>
    %88 = arith.addf %86, %87 : vector<8x64xf32>
    %c0_51 = arith.constant 0 : index
    %c0_52 = arith.constant 0 : index
    %c0_53 = arith.constant 0 : index
    %89 = vector.load %arg7[%c0_51, %c0_52, %c0_53] : memref<2x64x64xf32, #tpu.memory_space<vmem>>, vector<1x64x64xf32>
    %90 = vector.shape_cast %89 : vector<1x64x64xf32> to vector<64x64xf32>
    %91 = vector.extract_strided_slice %64 {offsets = [2, 0], sizes = [1, 64], strides = [1, 1]} : vector<9x64xf32> to vector<1x64xf32>
    %cst_54 = arith.constant dense<0.000000e+00> : vector<8x64xf32>
    %92 = tpu.matmul %88, %90, %cst_54 {dimension_numbers = #tpu.dot_dimension_numbers<[1], [0], [0], [1], [0, 0, 1, 1], [], []>} : vector<8x64xf32>, vector<64x64xf32>, vector<8x64xf32> -> vector<8x64xf32>
    %93 = vector.broadcast %91 : vector<1x64xf32> to vector<8x64xf32>
    %94 = arith.addf %92, %93 : vector<8x64xf32>
    %c0_55 = arith.constant 0 : index
    %c0_56 = arith.constant 0 : index
    %c0_57 = arith.constant 0 : index
    %95 = vector.load %arg8[%c0_55, %c0_56, %c0_57] : memref<2x64x64xf32, #tpu.memory_space<vmem>>, vector<1x64x64xf32>
    %96 = vector.shape_cast %95 : vector<1x64x64xf32> to vector<64x64xf32>
    %97 = vector.extract_strided_slice %64 {offsets = [3, 0], sizes = [1, 64], strides = [1, 1]} : vector<9x64xf32> to vector<1x64xf32>
    %cst_58 = arith.constant dense<0.000000e+00> : vector<8x64xf32>
    %98 = tpu.matmul %88, %96, %cst_58 {dimension_numbers = #tpu.dot_dimension_numbers<[1], [0], [0], [1], [0, 0, 1, 1], [], []>} : vector<8x64xf32>, vector<64x64xf32>, vector<8x64xf32> -> vector<8x64xf32>
    %99 = vector.broadcast %97 : vector<1x64xf32> to vector<8x64xf32>
    %100 = arith.addf %98, %99 : vector<8x64xf32>
    %c0_59 = arith.constant 0 : index
    %c0_60 = arith.constant 0 : index
    %c0_61 = arith.constant 0 : index
    %101 = vector.load %arg9[%c0_59, %c0_60, %c0_61] : memref<2x64x64xf32, #tpu.memory_space<vmem>>, vector<1x64x64xf32>
    %102 = vector.shape_cast %101 : vector<1x64x64xf32> to vector<64x64xf32>
    %103 = vector.extract_strided_slice %64 {offsets = [4, 0], sizes = [1, 64], strides = [1, 1]} : vector<9x64xf32> to vector<1x64xf32>
    %cst_62 = arith.constant dense<0.000000e+00> : vector<8x64xf32>
    %104 = tpu.matmul %88, %102, %cst_62 {dimension_numbers = #tpu.dot_dimension_numbers<[1], [0], [0], [1], [0, 0, 1, 1], [], []>} : vector<8x64xf32>, vector<64x64xf32>, vector<8x64xf32> -> vector<8x64xf32>
    %105 = vector.broadcast %103 : vector<1x64xf32> to vector<8x64xf32>
    %106 = arith.addf %104, %105 : vector<8x64xf32>
    "tpu.trace_start"() <{level = 10 : i32, message = "qd,kd->qk"}> : () -> ()
    %cst_63 = arith.constant dense<0.000000e+00> : vector<8x8xf32>
    %107 = tpu.matmul %94, %100, %cst_63 {dimension_numbers = #tpu.dot_dimension_numbers<[1], [1], [0], [0], [0, 0, 1, 0], [], []>} : vector<8x64xf32>, vector<8x64xf32>, vector<8x8xf32> -> vector<8x8xf32>
    "tpu.trace_stop"() : () -> ()
    %108 = arith.addf %107, %61 : vector<8x8xf32>
    %cst_64 = arith.constant dense<0xFF800000> : vector<8xf32>
    %109 = vector.multi_reduction <maximumf>, %108, %cst_64 [1] : vector<8x8xf32> to vector<8xf32>
    %110 = vector.shape_cast %109 : vector<8xf32> to vector<8x1xf32>
    %111 = vector.broadcast %110 : vector<8x1xf32> to vector<8x8xf32>
    %112 = arith.subf %108, %111 : vector<8x8xf32>
    %113 = math.exp %112 : vector<8x8xf32>
    %cst_65 = arith.constant dense<0.000000e+00> : vector<8xf32>
    %114 = vector.multi_reduction <add>, %113, %cst_65 [1] : vector<8x8xf32> to vector<8xf32>
    %115 = vector.shape_cast %114 : vector<8xf32> to vector<8x1xf32>
    %116 = vector.broadcast %115 : vector<8x1xf32> to vector<8x8xf32>
    %117 = arith.divf %113, %116 : vector<8x8xf32>
    %cst_66 = arith.constant dense<0.000000e+00> : vector<8x64xf32>
    %118 = tpu.matmul %117, %106, %cst_66 {dimension_numbers = #tpu.dot_dimension_numbers<[1], [0], [0], [1], [0, 0, 1, 1], [], []>} : vector<8x8xf32>, vector<8x64xf32>, vector<8x64xf32> -> vector<8x64xf32>
    %c0_67 = arith.constant 0 : index
    %c0_68 = arith.constant 0 : index
    %c0_69 = arith.constant 0 : index
    %119 = vector.load %arg10[%c0_67, %c0_68, %c0_69] : memref<2x64x64xf32, #tpu.memory_space<vmem>>, vector<1x64x64xf32>
    %120 = vector.shape_cast %119 : vector<1x64x64xf32> to vector<64x64xf32>
    %121 = vector.extract_strided_slice %64 {offsets = [5, 0], sizes = [1, 64], strides = [1, 1]} : vector<9x64xf32> to vector<1x64xf32>
    %cst_70 = arith.constant dense<0.000000e+00> : vector<8x64xf32>
    %122 = tpu.matmul %118, %120, %cst_70 {dimension_numbers = #tpu.dot_dimension_numbers<[1], [0], [0], [1], [0, 0, 1, 1], [], []>} : vector<8x64xf32>, vector<64x64xf32>, vector<8x64xf32> -> vector<8x64xf32>
    %123 = vector.broadcast %121 : vector<1x64xf32> to vector<8x64xf32>
    %124 = arith.addf %122, %123 : vector<8x64xf32>
    %125 = arith.addf %62, %124 : vector<8x64xf32>
    %126 = vector.extract_strided_slice %64 {offsets = [6, 0], sizes = [1, 64], strides = [1, 1]} : vector<9x64xf32> to vector<1x64xf32>
    %127 = vector.extract_strided_slice %64 {offsets = [7, 0], sizes = [1, 64], strides = [1, 1]} : vector<9x64xf32> to vector<1x64xf32>
    %cst_71 = arith.constant dense<0.000000e+00> : vector<8xf32>
    %128 = vector.multi_reduction <add>, %125, %cst_71 [1] : vector<8x64xf32> to vector<8xf32>
    %129 = vector.shape_cast %128 : vector<8xf32> to vector<8x1xf32>
    %cst_72 = arith.constant 6.400000e+01 : f32
    %130 = vector.broadcast %cst_72 : f32 to vector<8x1xf32>
    %131 = arith.divf %129, %130 : vector<8x1xf32>
    %132 = vector.broadcast %131 : vector<8x1xf32> to vector<8x64xf32>
    %133 = arith.subf %125, %132 : vector<8x64xf32>
    %134 = arith.mulf %133, %133 : vector<8x64xf32>
    %cst_73 = arith.constant dense<0.000000e+00> : vector<8xf32>
    %135 = vector.multi_reduction <add>, %134, %cst_73 [1] : vector<8x64xf32> to vector<8xf32>
    %136 = vector.shape_cast %135 : vector<8xf32> to vector<8x1xf32>
    %cst_74 = arith.constant 6.400000e+01 : f32
    %137 = vector.broadcast %cst_74 : f32 to vector<8x1xf32>
    %138 = arith.divf %136, %137 : vector<8x1xf32>
    %139 = vector.broadcast %131 : vector<8x1xf32> to vector<8x64xf32>
    %140 = arith.subf %125, %139 : vector<8x64xf32>
    %cst_75 = arith.constant 9.99999974E-6 : f32
    %141 = vector.broadcast %cst_75 : f32 to vector<8x1xf32>
    %142 = arith.addf %138, %141 : vector<8x1xf32>
    %143 = math.rsqrt %142 : vector<8x1xf32>
    %144 = vector.broadcast %143 : vector<8x1xf32> to vector<8x64xf32>
    %145 = arith.mulf %140, %144 : vector<8x64xf32>
    %146 = vector.broadcast %126 : vector<1x64xf32> to vector<8x64xf32>
    %147 = arith.mulf %145, %146 : vector<8x64xf32>
    %148 = vector.broadcast %127 : vector<1x64xf32> to vector<8x64xf32>
    %149 = arith.addf %147, %148 : vector<8x64xf32>
    %c0_76 = arith.constant 0 : index
    %c0_77 = arith.constant 0 : index
    %c0_78 = arith.constant 0 : index
    %150 = vector.load %arg11[%c0_76, %c0_77, %c0_78] : memref<2x64x256xf32, #tpu.memory_space<vmem>>, vector<1x64x256xf32>
    %151 = vector.shape_cast %150 : vector<1x64x256xf32> to vector<64x256xf32>
    %c0_79 = arith.constant 0 : index
    %c0_80 = arith.constant 0 : index
    %c0_81 = arith.constant 0 : index
    %152 = vector.load %arg6[%c0_79, %c0_80, %c0_81] : memref<2x1x256xf32, #tpu.memory_space<vmem>>, vector<1x1x256xf32>
    %153 = vector.shape_cast %152 : vector<1x1x256xf32> to vector<1x256xf32>
    %cst_82 = arith.constant dense<0.000000e+00> : vector<8x256xf32>
    %154 = tpu.matmul %149, %151, %cst_82 {dimension_numbers = #tpu.dot_dimension_numbers<[1], [0], [0], [1], [0, 0, 1, 1], [], []>} : vector<8x64xf32>, vector<64x256xf32>, vector<8x256xf32> -> vector<8x256xf32>
    %155 = vector.broadcast %153 : vector<1x256xf32> to vector<8x256xf32>
    %156 = arith.addf %154, %155 : vector<8x256xf32>
    %cst_83 = arith.constant 1.702000e+00 : f32
    %157 = vector.broadcast %cst_83 : f32 to vector<8x256xf32>
    %158 = arith.mulf %157, %156 : vector<8x256xf32>
    %159 = arith.negf %158 : vector<8x256xf32>
    %160 = math.exp %159 : vector<8x256xf32>
    %cst_84 = arith.constant 1.000000e+00 : f32
    %161 = vector.broadcast %cst_84 : f32 to vector<8x256xf32>
    %162 = arith.addf %161, %160 : vector<8x256xf32>
    %163 = arith.divf %161, %162 : vector<8x256xf32>
    %164 = arith.mulf %156, %163 : vector<8x256xf32>
    %c0_85 = arith.constant 0 : index
    %c0_86 = arith.constant 0 : index
    %c0_87 = arith.constant 0 : index
    %165 = vector.load %arg12[%c0_85, %c0_86, %c0_87] : memref<2x256x64xf32, #tpu.memory_space<vmem>>, vector<1x256x64xf32>
    %166 = vector.shape_cast %165 : vector<1x256x64xf32> to vector<256x64xf32>
    %167 = vector.extract_strided_slice %64 {offsets = [8, 0], sizes = [1, 64], strides = [1, 1]} : vector<9x64xf32> to vector<1x64xf32>
    %cst_88 = arith.constant dense<0.000000e+00> : vector<8x64xf32>
    %168 = tpu.matmul %164, %166, %cst_88 {dimension_numbers = #tpu.dot_dimension_numbers<[1], [0], [0], [1], [0, 0, 1, 1], [], []>} : vector<8x256xf32>, vector<256x64xf32>, vector<8x64xf32> -> vector<8x64xf32>
    %169 = vector.broadcast %167 : vector<1x64xf32> to vector<8x64xf32>
    %170 = arith.addf %168, %169 : vector<8x64xf32>
    %171 = arith.addf %125, %170 : vector<8x64xf32>
    %c1_89 = arith.constant 1 : index
    %c0_90 = arith.constant 0 : index
    %c0_91 = arith.constant 0 : index
    %172 = vector.load %arg5[%c1_89, %c0_90, %c0_91] : memref<2x9x64xf32, #tpu.memory_space<vmem>>, vector<1x9x64xf32>
    %173 = vector.shape_cast %172 : vector<1x9x64xf32> to vector<9x64xf32>
    %174 = vector.extract_strided_slice %173 {offsets = [0, 0], sizes = [1, 64], strides = [1, 1]} : vector<9x64xf32> to vector<1x64xf32>
    %175 = vector.extract_strided_slice %173 {offsets = [1, 0], sizes = [1, 64], strides = [1, 1]} : vector<9x64xf32> to vector<1x64xf32>
    %cst_92 = arith.constant dense<0.000000e+00> : vector<8xf32>
    %176 = vector.multi_reduction <add>, %171, %cst_92 [1] : vector<8x64xf32> to vector<8xf32>
    %177 = vector.shape_cast %176 : vector<8xf32> to vector<8x1xf32>
    %cst_93 = arith.constant 6.400000e+01 : f32
    %178 = vector.broadcast %cst_93 : f32 to vector<8x1xf32>
    %179 = arith.divf %177, %178 : vector<8x1xf32>
    %180 = vector.broadcast %179 : vector<8x1xf32> to vector<8x64xf32>
    %181 = arith.subf %171, %180 : vector<8x64xf32>
    %182 = arith.mulf %181, %181 : vector<8x64xf32>
    %cst_94 = arith.constant dense<0.000000e+00> : vector<8xf32>
    %183 = vector.multi_reduction <add>, %182, %cst_94 [1] : vector<8x64xf32> to vector<8xf32>
    %184 = vector.shape_cast %183 : vector<8xf32> to vector<8x1xf32>
    %cst_95 = arith.constant 6.400000e+01 : f32
    %185 = vector.broadcast %cst_95 : f32 to vector<8x1xf32>
    %186 = arith.divf %184, %185 : vector<8x1xf32>
    %187 = vector.broadcast %179 : vector<8x1xf32> to vector<8x64xf32>
    %188 = arith.subf %171, %187 : vector<8x64xf32>
    %cst_96 = arith.constant 9.99999974E-6 : f32
    %189 = vector.broadcast %cst_96 : f32 to vector<8x1xf32>
    %190 = arith.addf %186, %189 : vector<8x1xf32>
    %191 = math.rsqrt %190 : vector<8x1xf32>
    %192 = vector.broadcast %191 : vector<8x1xf32> to vector<8x64xf32>
    %193 = arith.mulf %188, %192 : vector<8x64xf32>
    %194 = vector.broadcast %174 : vector<1x64xf32> to vector<8x64xf32>
    %195 = arith.mulf %193, %194 : vector<8x64xf32>
    %196 = vector.broadcast %175 : vector<1x64xf32> to vector<8x64xf32>
    %197 = arith.addf %195, %196 : vector<8x64xf32>
    %c1_97 = arith.constant 1 : index
    %c0_98 = arith.constant 0 : index
    %c0_99 = arith.constant 0 : index
    %198 = vector.load %arg7[%c1_97, %c0_98, %c0_99] : memref<2x64x64xf32, #tpu.memory_space<vmem>>, vector<1x64x64xf32>
    %199 = vector.shape_cast %198 : vector<1x64x64xf32> to vector<64x64xf32>
    %200 = vector.extract_strided_slice %173 {offsets = [2, 0], sizes = [1, 64], strides = [1, 1]} : vector<9x64xf32> to vector<1x64xf32>
    %cst_100 = arith.constant dense<0.000000e+00> : vector<8x64xf32>
    %201 = tpu.matmul %197, %199, %cst_100 {dimension_numbers = #tpu.dot_dimension_numbers<[1], [0], [0], [1], [0, 0, 1, 1], [], []>} : vector<8x64xf32>, vector<64x64xf32>, vector<8x64xf32> -> vector<8x64xf32>
    %202 = vector.broadcast %200 : vector<1x64xf32> to vector<8x64xf32>
    %203 = arith.addf %201, %202 : vector<8x64xf32>
    %c1_101 = arith.constant 1 : index
    %c0_102 = arith.constant 0 : index
    %c0_103 = arith.constant 0 : index
    %204 = vector.load %arg8[%c1_101, %c0_102, %c0_103] : memref<2x64x64xf32, #tpu.memory_space<vmem>>, vector<1x64x64xf32>
    %205 = vector.shape_cast %204 : vector<1x64x64xf32> to vector<64x64xf32>
    %206 = vector.extract_strided_slice %173 {offsets = [3, 0], sizes = [1, 64], strides = [1, 1]} : vector<9x64xf32> to vector<1x64xf32>
    %cst_104 = arith.constant dense<0.000000e+00> : vector<8x64xf32>
    %207 = tpu.matmul %197, %205, %cst_104 {dimension_numbers = #tpu.dot_dimension_numbers<[1], [0], [0], [1], [0, 0, 1, 1], [], []>} : vector<8x64xf32>, vector<64x64xf32>, vector<8x64xf32> -> vector<8x64xf32>
    %208 = vector.broadcast %206 : vector<1x64xf32> to vector<8x64xf32>
    %209 = arith.addf %207, %208 : vector<8x64xf32>
    %c1_105 = arith.constant 1 : index
    %c0_106 = arith.constant 0 : index
    %c0_107 = arith.constant 0 : index
    %210 = vector.load %arg9[%c1_105, %c0_106, %c0_107] : memref<2x64x64xf32, #tpu.memory_space<vmem>>, vector<1x64x64xf32>
    %211 = vector.shape_cast %210 : vector<1x64x64xf32> to vector<64x64xf32>
    %212 = vector.extract_strided_slice %173 {offsets = [4, 0], sizes = [1, 64], strides = [1, 1]} : vector<9x64xf32> to vector<1x64xf32>
    %cst_108 = arith.constant dense<0.000000e+00> : vector<8x64xf32>
    %213 = tpu.matmul %197, %211, %cst_108 {dimension_numbers = #tpu.dot_dimension_numbers<[1], [0], [0], [1], [0, 0, 1, 1], [], []>} : vector<8x64xf32>, vector<64x64xf32>, vector<8x64xf32> -> vector<8x64xf32>
    %214 = vector.broadcast %212 : vector<1x64xf32> to vector<8x64xf32>
    %215 = arith.addf %213, %214 : vector<8x64xf32>
    "tpu.trace_start"() <{level = 10 : i32, message = "qd,kd->qk"}> : () -> ()
    %cst_109 = arith.constant dense<0.000000e+00> : vector<8x8xf32>
    %216 = tpu.matmul %203, %209, %cst_109 {dimension_numbers = #tpu.dot_dimension_numbers<[1], [1], [0], [0], [0, 0, 1, 0], [], []>} : vector<8x64xf32>, vector<8x64xf32>, vector<8x8xf32> -> vector<8x8xf32>
    "tpu.trace_stop"() : () -> ()
    %217 = arith.addf %216, %61 : vector<8x8xf32>
    %cst_110 = arith.constant dense<0xFF800000> : vector<8xf32>
    %218 = vector.multi_reduction <maximumf>, %217, %cst_110 [1] : vector<8x8xf32> to vector<8xf32>
    %219 = vector.shape_cast %218 : vector<8xf32> to vector<8x1xf32>
    %220 = vector.broadcast %219 : vector<8x1xf32> to vector<8x8xf32>
    %221 = arith.subf %217, %220 : vector<8x8xf32>
    %222 = math.exp %221 : vector<8x8xf32>
    %cst_111 = arith.constant dense<0.000000e+00> : vector<8xf32>
    %223 = vector.multi_reduction <add>, %222, %cst_111 [1] : vector<8x8xf32> to vector<8xf32>
    %224 = vector.shape_cast %223 : vector<8xf32> to vector<8x1xf32>
    %225 = vector.broadcast %224 : vector<8x1xf32> to vector<8x8xf32>
    %226 = arith.divf %222, %225 : vector<8x8xf32>
    %cst_112 = arith.constant dense<0.000000e+00> : vector<8x64xf32>
    %227 = tpu.matmul %226, %215, %cst_112 {dimension_numbers = #tpu.dot_dimension_numbers<[1], [0], [0], [1], [0, 0, 1, 1], [], []>} : vector<8x8xf32>, vector<8x64xf32>, vector<8x64xf32> -> vector<8x64xf32>
    %c1_113 = arith.constant 1 : index
    %c0_114 = arith.constant 0 : index
    %c0_115 = arith.constant 0 : index
    %228 = vector.load %arg10[%c1_113, %c0_114, %c0_115] : memref<2x64x64xf32, #tpu.memory_space<vmem>>, vector<1x64x64xf32>
    %229 = vector.shape_cast %228 : vector<1x64x64xf32> to vector<64x64xf32>
    %230 = vector.extract_strided_slice %173 {offsets = [5, 0], sizes = [1, 64], strides = [1, 1]} : vector<9x64xf32> to vector<1x64xf32>
    %cst_116 = arith.constant dense<0.000000e+00> : vector<8x64xf32>
    %231 = tpu.matmul %227, %229, %cst_116 {dimension_numbers = #tpu.dot_dimension_numbers<[1], [0], [0], [1], [0, 0, 1, 1], [], []>} : vector<8x64xf32>, vector<64x64xf32>, vector<8x64xf32> -> vector<8x64xf32>
    %232 = vector.broadcast %230 : vector<1x64xf32> to vector<8x64xf32>
    %233 = arith.addf %231, %232 : vector<8x64xf32>
    %234 = arith.addf %171, %233 : vector<8x64xf32>
    %235 = vector.extract_strided_slice %173 {offsets = [6, 0], sizes = [1, 64], strides = [1, 1]} : vector<9x64xf32> to vector<1x64xf32>
    %236 = vector.extract_strided_slice %173 {offsets = [7, 0], sizes = [1, 64], strides = [1, 1]} : vector<9x64xf32> to vector<1x64xf32>
    %cst_117 = arith.constant dense<0.000000e+00> : vector<8xf32>
    %237 = vector.multi_reduction <add>, %234, %cst_117 [1] : vector<8x64xf32> to vector<8xf32>
    %238 = vector.shape_cast %237 : vector<8xf32> to vector<8x1xf32>
    %cst_118 = arith.constant 6.400000e+01 : f32
    %239 = vector.broadcast %cst_118 : f32 to vector<8x1xf32>
    %240 = arith.divf %238, %239 : vector<8x1xf32>
    %241 = vector.broadcast %240 : vector<8x1xf32> to vector<8x64xf32>
    %242 = arith.subf %234, %241 : vector<8x64xf32>
    %243 = arith.mulf %242, %242 : vector<8x64xf32>
    %cst_119 = arith.constant dense<0.000000e+00> : vector<8xf32>
    %244 = vector.multi_reduction <add>, %243, %cst_119 [1] : vector<8x64xf32> to vector<8xf32>
    %245 = vector.shape_cast %244 : vector<8xf32> to vector<8x1xf32>
    %cst_120 = arith.constant 6.400000e+01 : f32
    %246 = vector.broadcast %cst_120 : f32 to vector<8x1xf32>
    %247 = arith.divf %245, %246 : vector<8x1xf32>
    %248 = vector.broadcast %240 : vector<8x1xf32> to vector<8x64xf32>
    %249 = arith.subf %234, %248 : vector<8x64xf32>
    %cst_121 = arith.constant 9.99999974E-6 : f32
    %250 = vector.broadcast %cst_121 : f32 to vector<8x1xf32>
    %251 = arith.addf %247, %250 : vector<8x1xf32>
    %252 = math.rsqrt %251 : vector<8x1xf32>
    %253 = vector.broadcast %252 : vector<8x1xf32> to vector<8x64xf32>
    %254 = arith.mulf %249, %253 : vector<8x64xf32>
    %255 = vector.broadcast %235 : vector<1x64xf32> to vector<8x64xf32>
    %256 = arith.mulf %254, %255 : vector<8x64xf32>
    %257 = vector.broadcast %236 : vector<1x64xf32> to vector<8x64xf32>
    %258 = arith.addf %256, %257 : vector<8x64xf32>
    %c1_122 = arith.constant 1 : index
    %c0_123 = arith.constant 0 : index
    %c0_124 = arith.constant 0 : index
    %259 = vector.load %arg11[%c1_122, %c0_123, %c0_124] : memref<2x64x256xf32, #tpu.memory_space<vmem>>, vector<1x64x256xf32>
    %260 = vector.shape_cast %259 : vector<1x64x256xf32> to vector<64x256xf32>
    %c1_125 = arith.constant 1 : index
    %c0_126 = arith.constant 0 : index
    %c0_127 = arith.constant 0 : index
    %261 = vector.load %arg6[%c1_125, %c0_126, %c0_127] : memref<2x1x256xf32, #tpu.memory_space<vmem>>, vector<1x1x256xf32>
    %262 = vector.shape_cast %261 : vector<1x1x256xf32> to vector<1x256xf32>
    %cst_128 = arith.constant dense<0.000000e+00> : vector<8x256xf32>
    %263 = tpu.matmul %258, %260, %cst_128 {dimension_numbers = #tpu.dot_dimension_numbers<[1], [0], [0], [1], [0, 0, 1, 1], [], []>} : vector<8x64xf32>, vector<64x256xf32>, vector<8x256xf32> -> vector<8x256xf32>
    %264 = vector.broadcast %262 : vector<1x256xf32> to vector<8x256xf32>
    %265 = arith.addf %263, %264 : vector<8x256xf32>
    %cst_129 = arith.constant 1.702000e+00 : f32
    %266 = vector.broadcast %cst_129 : f32 to vector<8x256xf32>
    %267 = arith.mulf %266, %265 : vector<8x256xf32>
    %268 = arith.negf %267 : vector<8x256xf32>
    %269 = math.exp %268 : vector<8x256xf32>
    %cst_130 = arith.constant 1.000000e+00 : f32
    %270 = vector.broadcast %cst_130 : f32 to vector<8x256xf32>
    %271 = arith.addf %270, %269 : vector<8x256xf32>
    %272 = arith.divf %270, %271 : vector<8x256xf32>
    %273 = arith.mulf %265, %272 : vector<8x256xf32>
    %c1_131 = arith.constant 1 : index
    %c0_132 = arith.constant 0 : index
    %c0_133 = arith.constant 0 : index
    %274 = vector.load %arg12[%c1_131, %c0_132, %c0_133] : memref<2x256x64xf32, #tpu.memory_space<vmem>>, vector<1x256x64xf32>
    %275 = vector.shape_cast %274 : vector<1x256x64xf32> to vector<256x64xf32>
    %276 = vector.extract_strided_slice %173 {offsets = [8, 0], sizes = [1, 64], strides = [1, 1]} : vector<9x64xf32> to vector<1x64xf32>
    %cst_134 = arith.constant dense<0.000000e+00> : vector<8x64xf32>
    %277 = tpu.matmul %273, %275, %cst_134 {dimension_numbers = #tpu.dot_dimension_numbers<[1], [0], [0], [1], [0, 0, 1, 1], [], []>} : vector<8x256xf32>, vector<256x64xf32>, vector<8x64xf32> -> vector<8x64xf32>
    %278 = vector.broadcast %276 : vector<1x64xf32> to vector<8x64xf32>
    %279 = arith.addf %277, %278 : vector<8x64xf32>
    %280 = arith.addf %234, %279 : vector<8x64xf32>
    %c0_135 = arith.constant 0 : index
    %c0_136 = arith.constant 0 : index
    %281 = vector.load %arg13[%c0_135, %c0_136] : memref<2x64xf32, #tpu.memory_space<vmem>>, vector<1x64xf32>
    %c1_137 = arith.constant 1 : index
    %c0_138 = arith.constant 0 : index
    %282 = vector.load %arg13[%c1_137, %c0_138] : memref<2x64xf32, #tpu.memory_space<vmem>>, vector<1x64xf32>
    %cst_139 = arith.constant dense<0.000000e+00> : vector<8xf32>
    %283 = vector.multi_reduction <add>, %280, %cst_139 [1] : vector<8x64xf32> to vector<8xf32>
    %284 = vector.shape_cast %283 : vector<8xf32> to vector<8x1xf32>
    %cst_140 = arith.constant 6.400000e+01 : f32
    %285 = vector.broadcast %cst_140 : f32 to vector<8x1xf32>
    %286 = arith.divf %284, %285 : vector<8x1xf32>
    %287 = vector.broadcast %286 : vector<8x1xf32> to vector<8x64xf32>
    %288 = arith.subf %280, %287 : vector<8x64xf32>
    %289 = arith.mulf %288, %288 : vector<8x64xf32>
    %cst_141 = arith.constant dense<0.000000e+00> : vector<8xf32>
    %290 = vector.multi_reduction <add>, %289, %cst_141 [1] : vector<8x64xf32> to vector<8xf32>
    %291 = vector.shape_cast %290 : vector<8xf32> to vector<8x1xf32>
    %cst_142 = arith.constant 6.400000e+01 : f32
    %292 = vector.broadcast %cst_142 : f32 to vector<8x1xf32>
    %293 = arith.divf %291, %292 : vector<8x1xf32>
    %294 = vector.broadcast %286 : vector<8x1xf32> to vector<8x64xf32>
    %295 = arith.subf %280, %294 : vector<8x64xf32>
    %cst_143 = arith.constant 9.99999974E-6 : f32
    %296 = vector.broadcast %cst_143 : f32 to vector<8x1xf32>
    %297 = arith.addf %293, %296 : vector<8x1xf32>
    %298 = math.rsqrt %297 : vector<8x1xf32>
    %299 = vector.broadcast %298 : vector<8x1xf32> to vector<8x64xf32>
    %300 = arith.mulf %295, %299 : vector<8x64xf32>
    %301 = vector.broadcast %281 : vector<1x64xf32> to vector<8x64xf32>
    %302 = arith.mulf %300, %301 : vector<8x64xf32>
    %303 = vector.broadcast %282 : vector<1x64xf32> to vector<8x64xf32>
    %304 = arith.addf %302, %303 : vector<8x64xf32>
    %c0_144 = arith.constant 0 : index
    %c0_145 = arith.constant 0 : index
    %305 = vector.load %arg15[%c0_144, %c0_145] : memref<8x64xf32, #tpu.memory_space<vmem>>, vector<8x64xf32>
    tpu.vector_store %arg15[%c0_144, %c0_145], %304 {strides = array<i32>} : memref<8x64xf32, #tpu.memory_space<vmem>>, vector<8x64xf32>,
    %306 = arith.index_cast %arg0 : i32 to index
    %307 = memref.load %arg2[%306] : memref<2xi32, #tpu.memory_space<smem>>
    %308 = arith.index_cast %307 : i32 to index
    %c0_146 = arith.constant 0 : index
    %309 = vector.load %arg15[%308, %c0_146] : memref<8x64xf32, #tpu.memory_space<vmem>>, vector<1x64xf32>
    %c0_147 = arith.constant 0 : index
    %c0_148 = arith.constant 0 : index
    %c0_149 = arith.constant 0 : index
    %310 = vector.load %arg14[%c0_147, %c0_148, %c0_149] : memref<1x1x64xf32, #tpu.memory_space<vmem>>, vector<1x1x64xf32>
    %311 = vector.shape_cast %310 : vector<1x1x64xf32> to vector<1x64xf32>
    %312 = vector.shape_cast %309 : vector<1x64xf32> to vector<1x1x64xf32>
    tpu.vector_store %arg14[%c0_147, %c0_148, %c0_149], %312 {strides = array<i32>} : memref<1x1x64xf32, #tpu.memory_space<vmem>>, vector<1x1x64xf32>,
    return
  }
  func.func @transform_0(%arg0: i32, %arg1: memref<2x8xi32, #tpu.memory_space<smem>>, %arg2: memref<2xi32, #tpu.memory_space<smem>>) -> (i32, i32) {
    %c0_i32 = arith.constant 0 : i32
    %c0_i32_0 = arith.constant 0 : i32
    %c0_i32_1 = arith.constant 0 : i32
    return %c0_i32, %c0_i32_0 : i32, i32
  }
  func.func @transform_1(%arg0: i32, %arg1: memref<2x8xi32, #tpu.memory_space<smem>>, %arg2: memref<2xi32, #tpu.memory_space<smem>>) -> (i32, i32) {
    %c0_i32 = arith.constant 0 : i32
    %c0_i32_0 = arith.constant 0 : i32
    %c0_i32_1 = arith.constant 0 : i32
    return %c0_i32, %c0_i32_0 : i32, i32
  }
  func.func @transform_2(%arg0: i32, %arg1: memref<2x8xi32, #tpu.memory_space<smem>>, %arg2: memref<2xi32, #tpu.memory_space<smem>>) -> (i32, i32, i32) {
    %c0_i32 = arith.constant 0 : i32
    %c0_i32_0 = arith.constant 0 : i32
    %c0_i32_1 = arith.constant 0 : i32
    %c0_i32_2 = arith.constant 0 : i32
    return %c0_i32, %c0_i32_0, %c0_i32_1 : i32, i32, i32
  }
  func.func @transform_3(%arg0: i32, %arg1: memref<2x8xi32, #tpu.memory_space<smem>>, %arg2: memref<2xi32, #tpu.memory_space<smem>>) -> (i32, i32, i32) {
    %c0_i32 = arith.constant 0 : i32
    %c0_i32_0 = arith.constant 0 : i32
    %c0_i32_1 = arith.constant 0 : i32
    %c0_i32_2 = arith.constant 0 : i32
    return %c0_i32, %c0_i32_0, %c0_i32_1 : i32, i32, i32
  }
  func.func @transform_4(%arg0: i32, %arg1: memref<2x8xi32, #tpu.memory_space<smem>>, %arg2: memref<2xi32, #tpu.memory_space<smem>>) -> (i32, i32, i32) {
    %c0_i32 = arith.constant 0 : i32
    %c0_i32_0 = arith.constant 0 : i32
    %c0_i32_1 = arith.constant 0 : i32
    %c0_i32_2 = arith.constant 0 : i32
    return %c0_i32, %c0_i32_0, %c0_i32_1 : i32, i32, i32
  }
  func.func @transform_5(%arg0: i32, %arg1: memref<2x8xi32, #tpu.memory_space<smem>>, %arg2: memref<2xi32, #tpu.memory_space<smem>>) -> (i32, i32, i32) {
    %c0_i32 = arith.constant 0 : i32
    %c0_i32_0 = arith.constant 0 : i32
    %c0_i32_1 = arith.constant 0 : i32
    %c0_i32_2 = arith.constant 0 : i32
    return %c0_i32, %c0_i32_0, %c0_i32_1 : i32, i32, i32
  }
  func.func @transform_6(%arg0: i32, %arg1: memref<2x8xi32, #tpu.memory_space<smem>>, %arg2: memref<2xi32, #tpu.memory_space<smem>>) -> (i32, i32, i32) {
    %c0_i32 = arith.constant 0 : i32
    %c0_i32_0 = arith.constant 0 : i32
    %c0_i32_1 = arith.constant 0 : i32
    %c0_i32_2 = arith.constant 0 : i32
    return %c0_i32, %c0_i32_0, %c0_i32_1 : i32, i32, i32
  }
  func.func @transform_7(%arg0: i32, %arg1: memref<2x8xi32, #tpu.memory_space<smem>>, %arg2: memref<2xi32, #tpu.memory_space<smem>>) -> (i32, i32, i32) {
    %c0_i32 = arith.constant 0 : i32
    %c0_i32_0 = arith.constant 0 : i32
    %c0_i32_1 = arith.constant 0 : i32
    %c0_i32_2 = arith.constant 0 : i32
    return %c0_i32, %c0_i32_0, %c0_i32_1 : i32, i32, i32
  }
  func.func @transform_8(%arg0: i32, %arg1: memref<2x8xi32, #tpu.memory_space<smem>>, %arg2: memref<2xi32, #tpu.memory_space<smem>>) -> (i32, i32, i32) {
    %c0_i32 = arith.constant 0 : i32
    %c0_i32_0 = arith.constant 0 : i32
    %c0_i32_1 = arith.constant 0 : i32
    %c0_i32_2 = arith.constant 0 : i32
    return %c0_i32, %c0_i32_0, %c0_i32_1 : i32, i32, i32
  }
  func.func @transform_9(%arg0: i32, %arg1: memref<2x8xi32, #tpu.memory_space<smem>>, %arg2: memref<2xi32, #tpu.memory_space<smem>>) -> (i32, i32, i32) {
    %c0_i32 = arith.constant 0 : i32
    %c0_i32_0 = arith.constant 0 : i32
    %c0_i32_1 = arith.constant 0 : i32
    %c0_i32_2 = arith.constant 0 : i32
    return %c0_i32, %c0_i32_0, %c0_i32_1 : i32, i32, i32
  }
  func.func @transform_10(%arg0: i32, %arg1: memref<2x8xi32, #tpu.memory_space<smem>>, %arg2: memref<2xi32, #tpu.memory_space<smem>>) -> (i32, i32) {
    %c0_i32 = arith.constant 0 : i32
    %c0_i32_0 = arith.constant 0 : i32
    %c0_i32_1 = arith.constant 0 : i32
    return %c0_i32, %c0_i32_0 : i32, i32
  }
  func.func @transform_11(%arg0: i32, %arg1: memref<2x8xi32, #tpu.memory_space<smem>>, %arg2: memref<2xi32, #tpu.memory_space<smem>>) -> (i32, i32, i32) {
    %c0_i32 = arith.constant 0 : i32
    %c0_i32_0 = arith.constant 0 : i32
    %c0_i32_1 = arith.constant 0 : i32
    return %arg0, %c0_i32, %c0_i32_0 : i32, i32, i32
  }
}

</mosaic_0001>

<bundles_post_ra>
// kernel: text_transformer_forward.1
= control target key start
LH: loop header
LB: loop body
LE: loop exit
PB: predicated region body
PF: predicated region fallthrough
CT: control target
= control target key end

     0   :  { %s1704_s14 = smov [#allocation4]   ;;  %s1705_s15 = smov [#allocation5]   ;;  %s2535_s0 = inlined_call_operand.vmem [shape: s32[2,8], index: 0, kind: input, shape index: {}]   ;;  %s2536_s2 = inlined_call_operand.vmem [shape: f32[32,64], index: 2, kind: input, shape index: {}]   ;;  %s2537_s3 = inlined_call_operand.vmem [shape: f32[8,64], index: 3, kind: input, shape index: {}]   ;;  %s2538_s4 = inlined_call_operand.vmem [shape: f32[2,9,64], index: 4, kind: input, shape index: {}]   ;;  %s2539_s5 = inlined_call_operand.vmem [shape: f32[2,1,256], index: 5, kind: input, shape index: {}]   ;;  %s2540_s6 = inlined_call_operand.vmem [shape: f32[2,64,64], index: 6, kind: input, shape index: {}]   ;;  %s2541_s7 = inlined_call_operand.vmem [shape: f32[2,64,64], index: 7, kind: input, shape index: {}]   ;;  %s2542_s8 = inlined_call_operand.vmem [shape: f32[2,64,64], index: 8, kind: input, shape index: {}]   ;;  %s2543_s9 = inlined_call_operand.vmem [shape: f32[2,64,64], index: 9, kind: input, shape index: {}]   ;;  %s2544_s10 = inlined_call_operand.vmem [shape: f32[2,64,256], index: 10, kind: input, shape index: {}]   ;;  %s2545_s11 = inlined_call_operand.vmem [shape: f32[2,256,64], index: 11, kind: input, shape index: {}]   ;;  %s2546_s12 = inlined_call_operand.vmem [shape: f32[2,64], index: 12, kind: input, shape index: {}]   ;;  %s2547_s13 = inlined_call_operand.hbm [shape: f32[2,1,64], index: 13, kind: output, shape index: {}]   ;;  %s2548_s1 = inlined_call_operand.vmem [shape: s32[2], index: 1, kind: input, shape index: {}]  }
   0x1   :  { %2560 = sst [smem:[#allocation18_spill]] %s2546_s12  ;;  %s19_s27 = sshll.u32 %s2535_s0, 4  ;;  %s20_s27 = int_to_ptr.vmem [resolvable:$true] %s19_s27 }
   0x2   :  { %2561 = sst [smem:[#allocation19_spill]] %s2547_s13  ;;  %s24_s30 = sshll.u32 %s2548_s1, 4  ;;  %s25_s30 = int_to_ptr.vmem [resolvable:$true] %s24_s30 }
   0x3   :  { %22 = dma.vmem_to_smem %s20_s27, 32, %s1704_s14, [#allocation3] }
   0x4   :  { %27 = dma.vmem_to_smem %s25_s30, 16, %s1705_s15, [#allocation3] }
   0x5   :  { %1682 = dma.done.wait [#allocation3], 48 }
   0x6   :  { %1683 = vsyncadd [#allocation3], 4294967248 }
   0x7   :  { %30 = sfence }
   0x8   :  { %31 = vsyncpa [#allocation7], 0 }
   0x9   :  { %33 = vsyncpa [#allocation7 + $0x1], 0  ;;  %s1784_s16 = smov 0   ;;  %s1786_s17 = smov 0  }
   0xa   :  { %s1788_s0 = smov 0   ;;  %s1790_s18 = smov 0  }
   0xb LB: > { %2562 = sst [smem:[#allocation10_spill]] %s1690_s16  ;;  %s1805_s1 = sadd.s32 4294967295, %s1702_s18   ;;  %s1702_s18 = sphi %s1790_s18, %s2580_s18   ;;  %s1698_s0 = sphi %s1788_s0, %s2583_s0   ;;  %s1694_s17 = sphi %s1786_s17, %s2582_s17   ;;  %s1690_s16 = sphi %s1784_s16, %s2581_s16  }
   0xc   : > { %2563 = sst [smem:[#allocation11_spill]] %s1694_s17  ;;  %s1420_s19 = sadd.s32 4294967294, %s1702_s18  }
   0xd   : > { %2564 = sst [smem:[#allocation12_spill]] %s1698_s0  ;;  %s1809_s20 = sadd.s32 1, %s1702_s18  }
   0xe   : > { %2565 = sst [smem:[#allocation13_spill]] %s1702_s18  ;;  %s277_s21 = sadd.s32 1, %s1698_s0 }
   0xf   : > { %2566 = sst [smem:[#allocation14_spill]] %s1809_s20  ;;  %s274_s22 = ssub.s32 %s1702_s18, %s1809_s20 }
  0x10   : > { %p287_p0 = scmp.ne.s32.totalorder %s1698_s0, %s1694_s17  ;;  %p275_p1 = scmp.eq.s32.totalorder %s274_s22, 0 }
  0x11   : > { %p288_p2 = scmp.eq.s32.totalorder %s1805_s1, 1  ;;  %p293_p3 = scmp.ne.s32.totalorder %s1694_s17, %s1690_s16 }
  0x12   : > { %p294_p4 = scmp.eq.s32.totalorder %s1420_s19, 1  ;;  %p1422_p7 = scmp.ge.s32.totalorder %s1702_s18, 1 }
  0x13   : > { %s1820_s23 = scalar_select %p275_p1, %s1698_s0, %s277_s21  }
  0x14   : > { %p1822_p5 = por %p288_p2, %p287_p0  ;;  %p1826_p6 = por %p294_p4, %p293_p3 }
  0x15   : > { %2567 = sst [smem:[#allocation15_spill]] %s1820_s23  ;;  %p345_p8 = scmp.lt.s32.totalorder %s1702_s18, 3 }
  0x16   : > { %s2568_s24 = scalar_select %p1822_p5, 1, 0 }
  0x17   : > { %s2570_s25 = scalar_select %p1826_p6, 1, 0 }
  0x18   : > { %2569 = sst [smem:[#allocation16_spill]] %s2568_s24  ;;  %p346_p9 = pnand %p1422_p7, %p345_p8 }
  0x19   : > { %2571 = sst [smem:[#allocation17_spill]] %s2570_s25  ;;  %s1423_s26 = sshll.u32 (!%p346_p9), %s1805_s1, 7 }
  0x1a   : > { %349 = sbr.rel (%p346_p9) target bundleno = 3587 (0xe03), region = 64  ;;  %s380_s27 = sld [smem:[#allocation4 + %s1423_s26]] (!%p346_p9) }
  0x1b   : > { %s387_s28 = sadd.s32 (!%p346_p9), 1, %s1423_s26  ;;  %s394_s30 = sadd.s32 (!%p346_p9), 2, %s1423_s26 }
  0x1c   : > { %s388_s29 = sld [smem:[#allocation4 + %s387_s28]] (!%p346_p9)  ;;  %s401_s15 = sadd.s32 (!%p346_p9), 3, %s1423_s26 }
  0x1d   : > { %s395_s14 = sld [smem:[#allocation4 + %s394_s30]] (!%p346_p9)  ;;  %s408_s21 = sadd.s32 (!%p346_p9), 4, %s1423_s26 }
  0x1e   : > { %s402_s19 = sld [smem:[#allocation4 + %s401_s15]] (!%p346_p9)  ;;  %s415_s23 = sadd.s32 (!%p346_p9), 5, %s1423_s26 }
  0x1f   : > { %s1833_s22 = sld [smem:[#allocation4 + %s408_s21]]  ;;  %v383_v0 = vld [vmem:[%s2537_s3] sm:$0x1]  ;;  %s422_s16 = sadd.s32 6, %s1423_s26  ;;  %v391_v1 = vld [vmem:[%s2537_s3 + $0x1] sm:$0x1] }
  0x20   : > { %s1838_s25 = sld [smem:[#allocation4 + %s415_s23]]  ;;  %s381_s24 = scalar_lea.vmem %s2536_s2, %s380_s27  ;;  %vm385_vm0 = vcmask 516096   ;;  %v398_v3 = vld [vmem:[%s2537_s3 + $0x2] sm:$0x1]  ;;  %v405_v6 = vld [vmem:[%s2537_s3 + $0x3] sm:$0x1] }
  0x21   : > { %s1846_s30 = sld [smem:[#allocation4 + %s422_s16]]  ;;  %v382_v2 = vld [vmem:[%s381_s24] sm:$0x1]  ;;  %s429_s17 = sadd.s32 7, %s1423_s26  ;;  %v412_v9 = vld [vmem:[%s2537_s3 + $0x4] sm:$0x1] }
  0x22   : > { %s389_s0 = scalar_lea.vmem %s2536_s2, %s388_s29  ;;  %v384_v4 = vadd.f32 %v383_v0, %v382_v2  ;;  %s430_s27 = sld [smem:[#allocation4 + %s429_s17]]  ;;  %v419_v12 = vld [vmem:[%s2537_s3 + $0x5] sm:$0x1]  ;;  %v426_v15 = vld [vmem:[%s2537_s3 + $0x6] sm:$0x1]  ;;  %vm445_vm1 = vcmask 523264  }
  0x23   : > { %v390_v5 = vld [vmem:[%s389_s0] sm:$0x1]  ;;  %s396_s12 = scalar_lea.vmem %s2536_s2, %s395_s14  ;;  %v433_v20 = vld [vmem:[%s2537_s3 + $0x7] sm:$0x1]  ;;  %v1706_v26 = vmov 64.0   ;;  %v518_v38 = vld [vmem:[%s2541_s7 + $0x38] sm:$0xff] }
  0x24   : > { %v392_v7 = vadd.f32 %v391_v1, %v390_v5  ;;  %v397_v8 = vld [vmem:[%s396_s12] sm:$0x1]  ;;  %s403_s15 = scalar_lea.vmem %s2536_s2, %s402_s19  ;;  %386 = vst.msk [vmem:[#allocation2] sm:$0x1] %vm385_vm0, %v384_v4  ;;  %1578 = vrcp.f32 %v1706_v26  ;;  %528 = vmatpush.msra.mxu2 %v518_v38  ;;  %v517_v39 = vld [vmem:[%s2541_s7 + $0x30] sm:$0xff]  ;;  %v516_v40 = vld [vmem:[%s2541_s7 + $0x28] sm:$0xff] }
  0x25   : > { %v399_v10 = vadd.f32 %v398_v3, %v397_v8  ;;  %v404_v11 = vld [vmem:[%s403_s15] sm:$0x1]  ;;  %s410_s20 = scalar_lea.vmem %s2536_s2, %s1833_s22  ;;  %v486_v42 = vld [vmem:[%s2540_s6 + $0x38] sm:$0xff]  ;;  %v485_v44 = vld [vmem:[%s2540_s6 + $0x30] sm:$0xff]  ;;  %vm595_vm7 = vcmask 64512   ;;  %s2572_s22 = sld [smem:[#allocation11_spill]] }
  0x26   : > { %393 = vst.msk [vmem:[#allocation2 + $0x1] sm:$0x1] %vm385_vm0, %v392_v7  ;;  %v406_v13 = vadd.f32 %v405_v6, %v404_v11  ;;  %v411_v14 = vld [vmem:[%s410_s20] sm:$0x1]  ;;  %s417_s18 = scalar_lea.vmem %s2536_s2, %s1838_s25  ;;  %529 = vmatpush.msra.mxu2 %v517_v39  ;;  %499 = vmatpush.msra.mxu0 %v486_v42  ;;  %v514_v43 = vld [vmem:[%s2541_s7 + $0x18] sm:$0xff]  ;;  %v513_v45 = vld [vmem:[%s2541_s7 + $0x10] sm:$0xff] }
  0x27   : > { %400 = vst.msk [vmem:[#allocation2 + $0x2] sm:$0x1] %vm385_vm0, %v399_v10  ;;  %v413_v16 = vadd.f32 %v412_v9, %v411_v14  ;;  %v418_v17 = vld [vmem:[%s417_s18] sm:$0x1]  ;;  %s424_s29 = scalar_lea.vmem %s2536_s2, %s1846_s30  ;;  %v484_v46 = vld [vmem:[%s2540_s6 + $0x28] sm:$0xff]  ;;  %v482_v50 = vld [vmem:[%s2540_s6 + $0x18] sm:$0xff] }
  0x28   : > { %407 = vst.msk [vmem:[#allocation2 + $0x3] sm:$0x1] %vm385_vm0, %v406_v13  ;;  %v420_v18 = vadd.f32 %v419_v12, %v418_v17  ;;  %v425_v19 = vld [vmem:[%s424_s29] sm:$0x1]  ;;  %s431_s21 = scalar_lea.vmem %s2536_s2, %s430_s27  ;;  %530 = vmatpush.msra.mxu2 %v516_v40  ;;  %500 = vmatpush.msra.mxu0 %v485_v44  ;;  %v512_v47 = vld [vmem:[%s2541_s7 + $0x8] sm:$0xff]  ;;  %v547_v51 = vld [vmem:[%s2542_s8 + $0x38] sm:$0xff] }
  0x29   : > { %414 = vst.msk [vmem:[#allocation2 + $0x4] sm:$0x1] %vm385_vm0, %v413_v16  ;;  %v427_v21 = vadd.f32 %v426_v15, %v425_v19  ;;  %v432_v22 = vld [vmem:[%s431_s21] sm:$0x1]  ;;  %v481_v52 = vld [vmem:[%s2540_s6 + $0x10] sm:$0xff]  ;;  %v480_v54 = vld [vmem:[%s2540_s6 + $0x8] sm:$0xff] }
  0x2a   : > { %421 = vst.msk [vmem:[#allocation2 + $0x5] sm:$0x1] %vm385_vm0, %v420_v18  ;;  %v434_v23 = vadd.f32 %v433_v20, %v432_v22  ;;  %v1579_v27 = vpop.eup %1578  ;;  %v515_v41 = vld [vmem:[%s2541_s7 + $0x20] sm:$0xff]  ;;  %501 = vmatpush.msra.mxu0 %v484_v46  ;;  %v546_v53 = vld [vmem:[%s2542_s8 + $0x30] sm:$0xff]  ;;  %v545_v55 = vld [vmem:[%s2542_s8 + $0x28] sm:$0xff]  ;;  %s2573_s28 = sld [smem:[#allocation18_spill]] }
  0x2b   : > { %428 = vst.msk [vmem:[#allocation2 + $0x6] sm:$0x1] %vm385_vm0, %v427_v21  ;;  %v450_v28 = vmul.f32 64.0, %v1579_v27  ;;  %vm454_vm2 = vweird.f32 %v1579_v27  ;;  %531 = vmatpush.msra.mxu2 %v515_v41  ;;  %v483_v48 = vld [vmem:[%s2540_s6 + $0x20] sm:$0xff]  ;;  %v543_v58 = vld [vmem:[%s2542_s8 + $0x18] sm:$0xff]  ;;  %v542_v59 = vld [vmem:[%s2542_s8 + $0x10] sm:$0xff] }
  0x2c   : > { %435 = vst.msk [vmem:[#allocation2 + $0x7] sm:$0x1] %vm385_vm0, %v434_v23  ;;  %502 = vmatpush.msra.mxu0 %v483_v48  ;;  %v511_v49 = vld [vmem:[%s2541_s7] sm:$0xff]  ;;  %v541_v60 = vld [vmem:[%s2542_s8 + $0x8] sm:$0xff]  ;;  %v436_v23 = vlaneseq  ;;  %v650_v38 = vld [vmem:[%s2543_s9 + $0x38] sm:$0xff]  ;;  %s1351_s26 = sld [smem:[#allocation5 + %s1805_s1]] }
  0x2d   : > { %v451_v29 = vsub.f32 1.0, %v450_v28  ;;  %532 = vmatpush.msra.mxu2 %v514_v43  ;;  %v479_v56 = vld [vmem:[%s2540_s6] sm:$0xff]  ;;  %v649_v39 = vld [vmem:[%s2543_s9 + $0x30] sm:$0xff]  ;;  %v648_v40 = vld [vmem:[%s2543_s9 + $0x28] sm:$0xff]  ;;  %s377_s21 = sand.u32 1, %s2572_s22   ;;  %s2575_s0 = sld [smem:[#allocation19_spill]] }
  0x2e   : > { %503 = vmatpush.msra.mxu0 %v482_v50  ;;  %v544_v57 = vld [vmem:[%s2542_s8 + $0x20] sm:$0xff]  ;;  %v439_v26 = vand.u32 127, %v436_v23  ;;  %v646_v42 = vld [vmem:[%s2543_s9 + $0x18] sm:$0xff]  ;;  %v645_v43 = vld [vmem:[%s2543_s9 + $0x10] sm:$0xff]  ;;  %s378_s23 = scalar_lea.vmem [#allocation6], %s377_s21  ;;  %s1356_s12 = scalar_lea.sflag [#allocation7], %s377_s21 }
  0x2f   : > { %v452_v30 = vmul.f32 %v1579_v27, %v451_v29  ;;  %533 = vmatpush.msra.mxu2 %v513_v45  ;;  %v540_v63 = vld [vmem:[%s2542_s8] sm:$0xff]  ;;  %v644_v44 = vld [vmem:[%s2543_s9 + $0x8] sm:$0xff]  ;;  %s1366_s19 = sshll.u32 %s378_s23, 4  ;;  %s1367_s19 = int_to_ptr.vmem [resolvable:$true] %s1366_s19 }
  0x30   : > { %504 = vmatpush.msra.mxu0 %v481_v52  ;;  %v1987_v6 = vld [vmem:[%s2538_s4] sm:$0xff] }
  0x31   : > { %v453_v31 = vadd.f32 %v1579_v27, %v452_v30  ;;  %534 = vmatpush.msra.mxu2 %v512_v47  ;;  %v475_v8 = vperm.slane %v1987_v6, 0  ;;  %v477_v11 = vperm.slane %v1987_v6, 1  ;;  %v519_v14 = vperm.slane %v1987_v6, 3  ;;  %v647_v41 = vld [vmem:[%s2543_s9 + $0x20] sm:$0xff] }
  0x32   : > { %505 = vmatpush.msra.mxu0 %v480_v54  ;;  %v487_v15 = vperm.slane %v1987_v6, 2  ;;  %v548_v20 = vperm.slane %v1987_v6, 4  ;;  %s1352_s18 = scalar_lea.vmem [#allocation2], %s1351_s26 }
  0x33   : > { %v1898_v24 = vld [vmem:[#allocation2] sm:$0xff]  ;;  %v1902_v32 = vsel %vm454_vm2, %v1579_v27, %v453_v31  ;;  %535 = vmatpush.msra.mxu2 %v511_v49  ;;  %v1707_v27 = vmov 0.0   ;;  %s2576_s20 = smov %s2575_s0  ;;  %s1364_s17 = scalar_lea.hbm %s2575_s0, %s1805_s1 }
  0x34   : > { %v446_v25 = vsel %vm445_vm1, %v1898_v24, 0.0  ;;  %506 = vmatpush.msra.mxu0 %v479_v56  ;;  %s1368_s13 = sshll.u32 %s1364_s17, 4  ;;  %s1658_s1 = scalar_lea.hbm %s2576_s20, 2  ;;  %s1369_s13 = int_to_ptr.hbm [resolvable:$true] %s1368_s13 }
  0x35   : > { %447 = vadd.xlane.f32.xlu0 %v446_v25  ;;  %557 = vmatpush.msrb.mxu2 %v547_v51  ;;  %v437_v25 = vshrl.u32 %v436_v23, 7  ;;  %s1652_s16 = sshra.s32 %s1369_s13, 4  ;;  %s1653_s16 = int_to_ptr.hbm [resolvable:$true] %s1652_s16 }
  0x36   : > { %s1654_s22 = scalar_lea.hbm %s1653_s16, 1  ;;  %p1659_p13 = scmp.lt.s32.totalorder %s1653_s16, %s2576_s20 }
  0x37   : > { %558 = vmatpush.msrb.mxu2 %v546_v53  ;;  %vm440_vm6 = vcmp.gt.s32.totalorder %v439_v26, %v437_v25  ;;  %p1655_p10 = scmp.ne.s32.totalorder %s1653_s16, %s1654_s22  ;;  %p1660_p0 = scmp.lt.s32.totalorder %s1658_s1, %s1654_s22 }
  0x38   : > { %v2000_v28 = vsel %vm440_vm6, -1e+30, %v1707_v27 }
  0x39   : > { %559 = vmatpush.msrb.mxu2 %v545_v55  ;;  %p1656_p11 = pnand %p1655_p10, %p1822_p5  ;;  %p1661_p1 = por %p1660_p0, %p1659_p13 }
  0x3b   : > { %560 = vmatpush.msrb.mxu2 %v544_v57  ;;  %v643_v57 = vld [vmem:[%s2543_s9] sm:$0xff]  ;;  %p1657_p12 = pneg %p1656_p11 }
  0x3d   : > { %561 = vmatpush.msrb.mxu2 %v543_v58  ;;  %p1662_p2 = pnand %p1661_p1, %p1657_p12 }
  0x3f   : > { %562 = vmatpush.msrb.mxu2 %v542_v59  ;;  %v651_v59 = vperm.slane %v1987_v6, 5 }
  0x41   : > { %563 = vmatpush.msrb.mxu2 %v541_v60 }
  0x43   : > { %564 = vmatpush.msrb.mxu2 %v540_v63 }
  0xa8   : > { %v448_v33 = vpop.xlane.xlu0 %447 }
  0xa9   : > { %v456_v34 = vmul.f32 %v1902_v32, %v448_v33 }
  0xab   : > { %v1906_v35 = vsub.f32 %v1898_v24, %v456_v34 }
  0xad   : > { %v458_v36 = vmul.f32 %v1906_v35, %v1906_v35 }
  0xaf   : > { %v459_v37 = vsel %vm445_vm1, %v458_v36, 0.0 }
  0xb0   : > { %460 = vadd.xlane.f32.xlu0 %v459_v37 }
 0x123   : > { %v461_v61 = vpop.xlane.xlu0 %460 }
 0x124   : > { %v462_v62 = vmul.f32 %v461_v61, %v1902_v32 }
 0x126   : > { %v463_v0 = vadd.f32 1e-05, %v462_v62 }
 0x128   : > { %1580 = vrsqrt.f32 %v463_v0  ;;  %vm470_vm4 = vweird.f32 %v463_v0 }
 0x12e   : > { %v1581_v1 = vpop.eup %1580 }
 0x12f   : > { %v465_v2 = vmul.f32 %v1581_v1, %v463_v0  ;;  %vm471_vm3 = vweird.f32 %v1581_v1 }
 0x130   : > { %vm472_vm5 = vmor %vm470_vm4, %vm471_vm3 }
 0x131   : > { %v466_v3 = vmul.f32 %v1581_v1, %v465_v2 }
 0x133   : > { %v467_v4 = vmul.f32 0.5, %v466_v3 }
 0x135   : > { %v468_v5 = vsub.f32 1.5, %v467_v4 }
 0x137   : > { %v469_v7 = vmul.f32 %v1581_v1, %v468_v5  ;;  %v716_v5 = vld [vmem:[%s2544_s10 + $0x70] sm:$0xff] }
 0x139   : > { %v473_v9 = vsel %vm472_vm5, %v1581_v1, %v469_v7  ;;  %v714_v7 = vld [vmem:[%s2544_s10 + $0x60] sm:$0xff] }
 0x13a   : > { %v474_v10 = vmul.f32 %v473_v9, %v1906_v35  ;;  %v712_v9 = vld [vmem:[%s2544_s10 + $0x50] sm:$0xff] }
 0x13c   : > { %v476_v12 = vmul.f32 %v475_v8, %v474_v10  ;;  %v715_v8 = vld [vmem:[%s2544_s10 + $0x68] sm:$0xff]  ;;  %v713_v10 = vld [vmem:[%s2544_s10 + $0x58] sm:$0xff] }
 0x13e   : > { %v478_v13 = vadd.f32 %v477_v11, %v476_v12  ;;  %v710_v11 = vld [vmem:[%s2544_s10 + $0x40] sm:$0xff]  ;;  %v711_v12 = vld [vmem:[%s2544_s10 + $0x48] sm:$0xff] }
 0x140   : > { %1424 = vmatmul.msk.f32.vlgmr.msra.gmra.mxu0 %vm445_vm1, %v478_v13  ;;  %1425 = vmatmul.msk.f32.vlgmr.msra.gmra.mxu2 %vm445_vm1, %v478_v13 }
 0x148   : > { %1426 = vmatmul.msk.f32.vlgmr.msrb.gmra.mxu2 %vm445_vm1, %v478_v13  ;;  %v708_v13 = vld [vmem:[%s2544_s10 + $0x30] sm:$0xff] }
 0x1bd   : > { %v508_v17 = vpop.f32.mrf.mxu0 }
 0x1be   : > { %v509_v19 = vadd.f32 %v508_v17, %v487_v15  ;;  %v706_v15 = vld [vmem:[%s2544_s10 + $0x20] sm:$0xff]  ;;  %v704_v17 = vld [vmem:[%s2544_s10 + $0x10] sm:$0xff] }
 0x1c3   : > { %v537_v16 = vpop.f32.mrf.mxu2 }
 0x1c4   : > { %v538_v18 = vadd.f32 %v537_v16, %v519_v14  ;;  %v709_v14 = vld [vmem:[%s2544_s10 + $0x38] sm:$0xff]  ;;  %v707_v16 = vld [vmem:[%s2544_s10 + $0x28] sm:$0xff] }
 0x1c6   : > { %1427 = vmatpush.xpose.msk.msrb.mxu0 %vm445_vm1, %v538_v18  ;;  %v705_v18 = vld [vmem:[%s2544_s10 + $0x18] sm:$0xff] }
 0x1c9   : > { %1428 = vmatmul.msk.f32.vlgmr.msrb.gmra.mxu0 %vm445_vm1, %v509_v19  ;;  %v702_v19 = vld [vmem:[%s2544_s10] sm:$0xff] }
 0x1cb   : > { %v566_v21 = vpop.f32.mrf.mxu2 }
 0x1cc   : > { %v567_v22 = vadd.f32 %v566_v21, %v548_v20  ;;  %v703_v20 = vld [vmem:[%s2544_s10 + $0x8] sm:$0xff] }
 0x1ce   : > { %638 = vmatpush.msra.mxu3 %v567_v22 }
 0x1d0   : > { %663 = vmatpush.msrb.mxu3 %v650_v38 }
 0x1d2   : > { %664 = vmatpush.msrb.mxu3 %v649_v39  ;;  %v840_v39 = vld [vmem:[%s2545_s11 + $0xf8] sm:$0xff] }
 0x1d4   : > { %665 = vmatpush.msrb.mxu3 %v648_v40  ;;  %v839_v40 = vld [vmem:[%s2545_s11 + $0xf0] sm:$0xff] }
 0x1d6   : > { %666 = vmatpush.msrb.mxu3 %v647_v41  ;;  %v824_v41 = vld [vmem:[%s2545_s11 + $0x78] sm:$0xff] }
 0x1d7   : > { %842 = vmatpush.msra.mxu2 %v824_v41 }
 0x1d8   : > { %667 = vmatpush.msrb.mxu3 %v646_v42  ;;  %v837_v42 = vld [vmem:[%s2545_s11 + $0xe0] sm:$0xff] }
 0x1da   : > { %668 = vmatpush.msrb.mxu3 %v645_v43  ;;  %v823_v43 = vld [vmem:[%s2545_s11 + $0x70] sm:$0xff] }
 0x1db   : > { %843 = vmatpush.msra.mxu2 %v823_v43 }
 0x1dc   : > { %669 = vmatpush.msrb.mxu3 %v644_v44  ;;  %v836_v44 = vld [vmem:[%s2545_s11 + $0xd8] sm:$0xff] }
 0x1de   : > { %670 = vmatpush.msrb.mxu3 %v643_v57  ;;  %v816_v57 = vld [vmem:[%s2545_s11 + $0x38] sm:$0xff] }
 0x246   : > { %v592_v29 = vpop.f32.mrf.mxu0 }
 0x247   : > { %v593_v30 = vadd.f32 %v592_v29, %v2000_v28 }
 0x249   : > { %v596_v31 = vsel %vm595_vm7, %v593_v30, -inf }
 0x24a   : > { %597 = vmax.xlane.f32.xlu1 %v596_v31 }
 0x2bd   : > { %v598_v33 = vpop.xlane.xlu1 %597 }
 0x2be   : > { %v599_v34 = vsub.f32 %v593_v30, %v598_v33  ;;  %v698_v33 = vperm.slane %v1987_v6, 6 }
 0x2c0   : > { %v600_v35 = vmul.f32 1.442695, %v599_v34 }
 0x2c2   : > { %1582 = vpow2.f32 %v600_v35 }
 0x2c8   : > { %v1583_v36 = vpop.eup %1582 }
 0x2c9   : > { %v602_v37 = vsel %vm595_vm7, %v1583_v36, 0.0 }
 0x2ca   : > { %603 = vadd.xlane.f32.xlu1 %v602_v37 }
 0x33d   : > { %v604_v45 = vpop.xlane.xlu1 %603 }
 0x33e   : > { %1584 = vrcp.f32 %v604_v45  ;;  %v616_v49 = vand.u32 2147483648, %v604_v45  ;;  %v614_v51 = vand.u32 2147483647, %v604_v45  ;;  %vm610_vm9 = vweird.f32 %v604_v45 }
 0x340   : > { %v617_v53 = vor.u32 1.1754944e-38, %v616_v49  ;;  %vm615_vm11 = vcmp.eq.f32.partialorder %v614_v51, 8.507059e+37  ;;  %v820_v49 = vld [vmem:[%s2545_s11 + $0x58] sm:$0xff]  ;;  %v819_v51 = vld [vmem:[%s2545_s11 + $0x50] sm:$0xff] }
 0x344   : > { %v1585_v46 = vpop.eup %1584 }
 0x345   : > { %v606_v47 = vmul.f32 %v1585_v46, %v604_v45  ;;  %vm611_vm8 = vweird.f32 %v1585_v46  ;;  %v822_v45 = vld [vmem:[%s2545_s11 + $0x68] sm:$0xff] }
 0x346   : > { %vm612_vm10 = vmor %vm610_vm9, %vm611_vm8  ;;  %844 = vmatpush.msra.mxu2 %v822_v45 }
 0x347   : > { %v607_v48 = vsub.f32 1.0, %v606_v47  ;;  %v821_v47 = vld [vmem:[%s2545_s11 + $0x60] sm:$0xff] }
 0x348   : > { %845 = vmatpush.msra.mxu2 %v821_v47 }
 0x349   : > { %v608_v50 = vmul.f32 %v1585_v46, %v607_v48  ;;  %v834_v48 = vld [vmem:[%s2545_s11 + $0xc8] sm:$0xff] }
 0x34a   : > { %846 = vmatpush.msra.mxu2 %v820_v49 }
 0x34b   : > { %v609_v52 = vadd.f32 %v1585_v46, %v608_v50  ;;  %v833_v50 = vld [vmem:[%s2545_s11 + $0xc0] sm:$0xff] }
 0x34c   : > { %847 = vmatpush.msra.mxu2 %v819_v51 }
 0x34d   : > { %v613_v54 = vsel %vm612_vm10, %v1585_v46, %v609_v52  ;;  %v835_v46 = vld [vmem:[%s2545_s11 + $0xd0] sm:$0xff]  ;;  %v832_v52 = vld [vmem:[%s2545_s11 + $0xb8] sm:$0xff] }
 0x34e   : > { %v618_v55 = vsel %vm615_vm11, %v617_v53, %v613_v54  ;;  %v818_v53 = vld [vmem:[%s2545_s11 + $0x48] sm:$0xff]  ;;  %v831_v54 = vld [vmem:[%s2545_s11 + $0xb0] sm:$0xff] }
 0x34f   : > { %v619_v56 = vmul.f32 %v1583_v36, %v618_v55  ;;  %v700_v36 = vperm.slane %v1987_v6, 7  ;;  %v838_v6 = vld [vmem:[%s2545_s11 + $0xe8] sm:$0xff]  ;;  %848 = vmatpush.msra.mxu2 %v818_v53  ;;  %v817_v55 = vld [vmem:[%s2545_s11 + $0x40] sm:$0xff] }
 0x351   : > { %1429 = vmatmul.msk.f32.vlgmr.msra.gmra.mxu3 %vm595_vm7, %v619_v56  ;;  %v830_v56 = vld [vmem:[%s2545_s11 + $0xa8] sm:$0xff]  ;;  %849 = vmatpush.msra.mxu2 %v817_v55 }
 0x352   : > { %735 = vmatpush.msra.mxu3 %v716_v5 }
 0x353   : > { %850 = vmatpush.msra.mxu2 %v816_v57 }
 0x354   : > { %736 = vmatpush.msra.mxu3 %v714_v7  ;;  %v825_v7 = vld [vmem:[%s2545_s11 + $0x80] sm:$0xff] }
 0x356   : > { %737 = vmatpush.msra.mxu3 %v712_v9 }
 0x358   : > { %738 = vmatpush.msra.mxu3 %v710_v11 }
 0x35a   : > { %739 = vmatpush.msra.mxu3 %v708_v13 }
 0x35c   : > { %740 = vmatpush.msra.mxu3 %v706_v15  ;;  %v809_v15 = vld [vmem:[%s2545_s11] sm:$0xff] }
 0x35e   : > { %741 = vmatpush.msra.mxu3 %v704_v17 }
 0x360   : > { %742 = vmatpush.msra.mxu3 %v702_v19 }
 0x3d4   : > { %v640_v58 = vpop.f32.mrf.mxu3 }
 0x3d5   : > { %1430 = vmatmul.msk.f32.vlgmr.msrb.gmra.mxu3 %vm445_vm1, %v640_v58  ;;  %v829_v58 = vld [vmem:[%s2545_s11 + $0xa0] sm:$0xff] }
 0x3d6   : > { %862 = vmatpush.msrb.mxu3 %v840_v39 }
 0x3d8   : > { %863 = vmatpush.msrb.mxu3 %v839_v40 }
 0x3da   : > { %864 = vmatpush.msrb.mxu3 %v838_v6 }
 0x3dc   : > { %865 = vmatpush.msrb.mxu3 %v837_v42 }
 0x3de   : > { %866 = vmatpush.msrb.mxu3 %v836_v44 }
 0x3e0   : > { %867 = vmatpush.msrb.mxu3 %v835_v46  ;;  %v1574_v46 = vld [vmem:[%s2538_s4 + $0x8] ss:$0 sm:$0xff] }
 0x3e2   : > { %868 = vmatpush.msrb.mxu3 %v834_v48 }
 0x3e4   : > { %869 = vmatpush.msrb.mxu3 %v833_v50 }
 0x3e6   : > { %870 = vmatpush.msrb.mxu3 %v832_v52 }
 0x3e8   : > { %871 = vmatpush.msrb.mxu3 %v831_v54 }
 0x3ea   : > { %872 = vmatpush.msrb.mxu3 %v830_v56 }
 0x3ec   : > { %873 = vmatpush.msrb.mxu3 %v829_v58  ;;  %v1443_v58 = vld [vmem:[%s2540_s6 + $0x70] sm:$0xff] }
 0x458   : > { %v672_v60 = vpop.f32.mrf.mxu3 }
 0x459   : > { %v673_v61 = vadd.f32 %v672_v60, %v651_v59  ;;  %v718_v59 = vld [vmem:[%s2539_s5] sm:$0x3]  ;;  %v815_v60 = vld [vmem:[%s2545_s11 + $0x30] sm:$0xff] }
 0x45a   : > { %851 = vmatpush.msra.mxu2 %v815_v60  ;;  %v720_v9 = vperm.slane %v718_v59, 0  ;;  %v1441_v60 = vld [vmem:[%s2540_s6 + $0x60] sm:$0xff] }
 0x45b   : > { %v2033_v62 = vadd.f32 %v673_v61, %v1898_v24  ;;  %v717_v24 = vld [vmem:[%s2544_s10 + $0x78] sm:$0xff] }
 0x45c   : > { %755 = vmatpush.msra.mxu1 %v717_v24  ;;  %v828_v61 = vld [vmem:[%s2545_s11 + $0x98] sm:$0xff] }
 0x45d   : > { %v676_v63 = vsel %vm445_vm1, %v2033_v62, 0.0  ;;  %874 = vmatpush.msrb.mxu3 %v828_v61  ;;  %v812_v24 = vld [vmem:[%s2545_s11 + $0x18] sm:$0xff] }
 0x45e   : > { %677 = vadd.xlane.f32.xlu2 %v676_v63  ;;  %756 = vmatpush.msra.mxu1 %v715_v8  ;;  %v721_v63 = vperm.slane %v718_v59, 1  ;;  %v1442_v59 = vld [vmem:[%s2540_s6 + $0x68] sm:$0xff]  ;;  %v1453_v61 = vld [vmem:[%s2541_s7 + $0x78] sm:$0xff] }
 0x460   : > { %757 = vmatpush.msra.mxu1 %v713_v10  ;;  %v811_v10 = vld [vmem:[%s2545_s11 + $0x10] sm:$0xff] }
 0x462   : > { %758 = vmatpush.msra.mxu1 %v711_v12  ;;  %v810_v12 = vld [vmem:[%s2545_s11 + $0x8] sm:$0xff] }
 0x464   : > { %759 = vmatpush.msra.mxu1 %v709_v14 }
 0x466   : > { %760 = vmatpush.msra.mxu1 %v707_v16 }
 0x468   : > { %761 = vmatpush.msra.mxu1 %v705_v18 }
 0x46a   : > { %762 = vmatpush.msra.mxu1 %v703_v20 }
 0x46c   : > { %963 = vmatpush.msrb.mxu1 %v1453_v61 }
 0x4d1   : > { %v678_v0 = vpop.xlane.xlu2 %677 }
 0x4d2   : > { %v679_v1 = vmul.f32 %v678_v0, %v1902_v32  ;;  %v814_v0 = vld [vmem:[%s2545_s11 + $0x28] sm:$0xff] }
 0x4d3   : > { %852 = vmatpush.msra.mxu2 %v814_v0  ;;  %v1452_v0 = vld [vmem:[%s2541_s7 + $0x70] sm:$0xff] }
 0x4d4   : > { %v680_v2 = vsub.f32 %v2033_v62, %v679_v1  ;;  %v827_v1 = vld [vmem:[%s2545_s11 + $0x90] sm:$0xff]  ;;  %964 = vmatpush.msrb.mxu1 %v1452_v0 }
 0x4d5   : > { %875 = vmatpush.msrb.mxu3 %v827_v1  ;;  %v1439_v1 = vld [vmem:[%s2540_s6 + $0x50] sm:$0xff] }
 0x4d6   : > { %v681_v3 = vmul.f32 %v680_v2, %v680_v2 }
 0x4d8   : > { %v682_v4 = vsel %vm445_vm1, %v681_v3, 0.0  ;;  %v826_v3 = vld [vmem:[%s2545_s11 + $0x88] sm:$0xff] }
 0x4d9   : > { %683 = vadd.xlane.f32.xlu2 %v682_v4  ;;  %876 = vmatpush.msrb.mxu3 %v826_v3  ;;  %v1438_v3 = vld [vmem:[%s2540_s6 + $0x48] sm:$0xff] }
 0x4db   : > { %877 = vmatpush.msrb.mxu3 %v825_v7  ;;  %v1462_v7 = vld [vmem:[%s2542_s8 + $0x78] sm:$0xff] }
 0x54c   : > { %v684_v21 = vpop.xlane.xlu2 %683 }
 0x54d   : > { %v685_v22 = vmul.f32 %v684_v21, %v1902_v32 }
 0x54f   : > { %v686_v23 = vadd.f32 1e-05, %v685_v22 }
 0x551   : > { %1586 = vrsqrt.f32 %v686_v23  ;;  %vm693_vm13 = vweird.f32 %v686_v23 }
 0x557   : > { %v1587_v25 = vpop.eup %1586 }
 0x558   : > { %v688_v26 = vmul.f32 %v1587_v25, %v686_v23  ;;  %vm694_vm12 = vweird.f32 %v1587_v25 }
 0x559   : > { %vm695_vm14 = vmor %vm693_vm13, %vm694_vm12 }
 0x55a   : > { %v689_v27 = vmul.f32 %v1587_v25, %v688_v26 }
 0x55c   : > { %v690_v29 = vmul.f32 0.5, %v689_v27 }
 0x55e   : > { %v691_v30 = vsub.f32 1.5, %v690_v29 }
 0x560   : > { %v692_v31 = vmul.f32 %v1587_v25, %v691_v30 }
 0x562   : > { %v696_v34 = vsel %vm695_vm14, %v1587_v25, %v692_v31 }
 0x563   : > { %v697_v35 = vmul.f32 %v696_v34, %v680_v2  ;;  %v813_v2 = vld [vmem:[%s2545_s11 + $0x20] sm:$0xff] }
 0x564   : > { %853 = vmatpush.msra.mxu2 %v813_v2  ;;  %v1451_v2 = vld [vmem:[%s2541_s7 + $0x68] sm:$0xff] }
 0x565   : > { %v699_v37 = vmul.f32 %v698_v33, %v697_v35  ;;  %965 = vmatpush.msrb.mxu1 %v1451_v2 }
 0x566   : > { %854 = vmatpush.msra.mxu2 %v812_v24  ;;  %v1449_v24 = vld [vmem:[%s2541_s7 + $0x58] sm:$0xff] }
 0x567   : > { %v701_v38 = vadd.f32 %v700_v36, %v699_v37 }
 0x568   : > { %855 = vmatpush.msra.mxu2 %v811_v10  ;;  %v1447_v10 = vld [vmem:[%s2541_s7 + $0x48] sm:$0xff] }
 0x569   : > { %1431 = vmatmul.msk.f32.vlgmr.msra.gmra.mxu3 %vm445_vm1, %v701_v38  ;;  %1432 = vmatmul.msk.f32.vlgmr.msra.gmra.mxu1 %vm445_vm1, %v701_v38 }
 0x56a   : > { %856 = vmatpush.msra.mxu2 %v810_v12  ;;  %v1446_v12 = vld [vmem:[%s2541_s7 + $0x40] sm:$0xff] }
 0x56c   : > { %857 = vmatpush.msra.mxu2 %v809_v15  ;;  %v1457_v15 = vld [vmem:[%s2542_s8 + $0x50] sm:$0xff] }
 0x5e6   : > { %v764_v4 = vpop.f32.mrf.mxu1 }
 0x5e7   : > { %v765_v5 = vadd.f32 %v764_v4, %v721_v63  ;;  %v1440_v63 = vld [vmem:[%s2540_s6 + $0x58] sm:$0xff]  ;;  %v1450_v4 = vld [vmem:[%s2541_s7 + $0x60] sm:$0xff] }
 0x5e8   : > { %966 = vmatpush.msrb.mxu1 %v1450_v4 }
 0x5e9   : > { %v1434_v8 = vmul.f32 -1.702, %v765_v5 }
 0x5ea   : > { %967 = vmatpush.msrb.mxu1 %v1449_v24 }
 0x5eb   : > { %v773_v11 = vmul.f32 1.442695, %v1434_v8  ;;  %v1448_v8 = vld [vmem:[%s2541_s7 + $0x50] sm:$0xff] }
 0x5ec   : > { %v744_v13 = vpop.f32.mrf.mxu3  ;;  %968 = vmatpush.msrb.mxu1 %v1448_v8  ;;  %v1467_v8 = vld [vmem:[%s2543_s9 + $0x40] sm:$0xff] }
 0x5ed   : > { %1588 = vpow2.f32 %v773_v11  ;;  %v745_v14 = vadd.f32 %v744_v13, %v720_v9  ;;  %v1461_v9 = vld [vmem:[%s2542_s8 + $0x70] sm:$0xff]  ;;  %v1460_v11 = vld [vmem:[%s2542_s8 + $0x68] sm:$0xff]  ;;  %v1459_v13 = vld [vmem:[%s2542_s8 + $0x60] sm:$0xff] }
 0x5ee   : > { %969 = vmatpush.msrb.mxu1 %v1447_v10 }
 0x5ef   : > { %v1433_v16 = vmul.f32 -1.702, %v745_v14 }
 0x5f0   : > { %970 = vmatpush.msrb.mxu1 %v1446_v12 }
 0x5f1   : > { %v771_v17 = vmul.f32 1.442695, %v1433_v16  ;;  %v1456_v16 = vld [vmem:[%s2542_s8 + $0x48] sm:$0xff] }
 0x5f3   : > { %v1589_v18 = vpop.eup %1588  ;;  %1590 = vpow2.f32 %v771_v17 }
 0x5f4   : > { %v776_v19 = vadd.f32 1.0, %v1589_v18 }
 0x5f6   : > { %1592 = vrcp.f32 %v776_v19  ;;  %v803_v26 = vand.u32 2147483648, %v776_v19  ;;  %v801_v29 = vand.u32 2147483647, %v776_v19  ;;  %vm797_vm2 = vweird.f32 %v776_v19 }
 0x5f8   : > { %v804_v34 = vor.u32 1.1754944e-38, %v803_v26  ;;  %vm802_vm4 = vcmp.eq.f32.partialorder %v801_v29, 8.507059e+37  ;;  %v2283_v26 = vld [vmem:[%s2538_s4 + $0x10] sm:$0xff] }
 0x5f9   : > { %v1591_v20 = vpop.eup %1590  ;;  %v1087_v10 = vperm.slane %v2283_v26, 5 }
 0x5fa   : > { %v775_v21 = vadd.f32 1.0, %v1591_v20 }
 0x5fc   : > { %v1593_v22 = vpop.eup %1592  ;;  %1594 = vrcp.f32 %v775_v21  ;;  %v788_v38 = vand.u32 2147483648, %v775_v21  ;;  %v786_v6 = vand.u32 2147483647, %v775_v21  ;;  %vm782_vm6 = vweird.f32 %v775_v21 }
 0x5fd   : > { %v793_v23 = vmul.f32 %v1593_v22, %v776_v19  ;;  %vm798_vm15 = vweird.f32 %v1593_v22  ;;  %v1455_v19 = vld [vmem:[%s2542_s8 + $0x40] sm:$0xff] }
 0x5fe   : > { %vm799_vm3 = vmor %vm797_vm2, %vm798_vm15  ;;  %v789_v42 = vor.u32 1.1754944e-38, %v788_v38  ;;  %vm787_vm9 = vcmp.eq.f32.partialorder %v786_v6, 8.507059e+37  ;;  %v921_v38 = vperm.slane %v2283_v26, 2 }
 0x5ff   : > { %v794_v25 = vsub.f32 1.0, %v793_v23 }
 0x601   : > { %v795_v27 = vmul.f32 %v1593_v22, %v794_v25 }
 0x602   : > { %v1595_v30 = vpop.eup %1594 }
 0x603   : > { %v796_v31 = vadd.f32 %v1593_v22, %v795_v27  ;;  %v778_v33 = vmul.f32 %v1595_v30, %v775_v21  ;;  %vm783_vm5 = vweird.f32 %v1595_v30 }
 0x604   : > { %vm784_vm8 = vmor %vm782_vm6, %vm783_vm5 }
 0x605   : > { %v800_v35 = vsel %vm799_vm3, %v1593_v22, %v796_v31  ;;  %v779_v36 = vsub.f32 1.0, %v778_v33 }
 0x606   : > { %v805_v37 = vsel %vm802_vm4, %v804_v34, %v800_v35  ;;  %v910_v34 = vperm.slane %v2283_v26, 1 }
 0x607   : > { %v808_v39 = vmul.f32 %v805_v37, %v765_v5  ;;  %v780_v40 = vmul.f32 %v1595_v30, %v779_v36  ;;  %v1437_v5 = vld [vmem:[%s2540_s6 + $0x40] sm:$0xff]  ;;  %v954_v37 = vperm.slane %v2283_v26, 3 }
 0x609   : > { %v781_v41 = vadd.f32 %v1595_v30, %v780_v40  ;;  %878 = vmatmul.f32.vlgmr.msrb.gmra.mxu3 %v808_v39 }
 0x60b   : > { %v785_v43 = vsel %vm784_vm8, %v1595_v30, %v781_v41  ;;  %v908_v30 = vperm.slane %v2283_v26, 0 }
 0x60c   : > { %v790_v44 = vsel %vm787_vm9, %v789_v42, %v785_v43  ;;  %v984_v42 = vperm.slane %v2283_v26, 4 }
 0x60d   : > { %v807_v45 = vmul.f32 %v790_v44, %v745_v14  ;;  %v1458_v14 = vld [vmem:[%s2542_s8 + $0x58] sm:$0xff] }
 0x60f   : > { %858 = vmatmul.f32.vlgmr.msra.gmra.mxu2 %v807_v45 }
 0x68c   : > { %v879_v49 = vpop.f32.mrf.mxu3 }
 0x692   : > { %v859_v47 = vpop.f32.mrf.mxu2 }
 0x693   : > { %v860_v48 = vadd.f32 %v1574_v46, %v859_v47 }
 0x695   : > { %v880_v50 = vadd.f32 %v879_v49, %v860_v48 }
 0x697   : > { %v2196_v51 = vadd.f32 %v880_v50, %v2033_v62  ;;  %v1444_v62 = vld [vmem:[%s2540_s6 + $0x78] sm:$0xff] }
 0x698   : > { %933 = vmatpush.msra.mxu0 %v1444_v62  ;;  %v1469_v62 = vld [vmem:[%s2543_s9 + $0x50] sm:$0xff] }
 0x699   : > { %v886_v52 = vsel %vm445_vm1, %v2196_v51, 0.0 }
 0x69a   : > { %887 = vadd.xlane.f32.xlu0 %v886_v52  ;;  %934 = vmatpush.msra.mxu0 %v1443_v58  ;;  %v1468_v58 = vld [vmem:[%s2543_s9 + $0x48] sm:$0xff] }
 0x69c   : > { %935 = vmatpush.msra.mxu0 %v1442_v59 }
 0x69e   : > { %936 = vmatpush.msra.mxu0 %v1441_v60 }
 0x6a0   : > { %937 = vmatpush.msra.mxu0 %v1440_v63 }
 0x6a2   : > { %938 = vmatpush.msra.mxu0 %v1439_v1 }
 0x6a4   : > { %939 = vmatpush.msra.mxu0 %v1438_v3 }
 0x6a6   : > { %940 = vmatpush.msra.mxu0 %v1437_v5 }
 0x6a8   : > { %993 = vmatpush.msrb.mxu0 %v1462_v7 }
 0x6aa   : > { %994 = vmatpush.msrb.mxu0 %v1461_v9 }
 0x6ac   : > { %995 = vmatpush.msrb.mxu0 %v1460_v11 }
 0x6ae   : > { %996 = vmatpush.msrb.mxu0 %v1459_v13 }
 0x6b0   : > { %997 = vmatpush.msrb.mxu0 %v1458_v14 }
 0x6b2   : > { %998 = vmatpush.msrb.mxu0 %v1457_v15 }
 0x6b4   : > { %999 = vmatpush.msrb.mxu0 %v1456_v16 }
 0x6b6   : > { %1000 = vmatpush.msrb.mxu0 %v1455_v19 }
 0x70d   : > { %v888_v53 = vpop.xlane.xlu0 %887 }
 0x70e   : > { %v889_v54 = vmul.f32 %v888_v53, %v1902_v32 }
 0x710   : > { %v2202_v55 = vsub.f32 %v2196_v51, %v889_v54  ;;  %v1474_v54 = vld [vmem:[%s2543_s9 + $0x78] sm:$0xff] }
 0x712   : > { %v891_v56 = vmul.f32 %v2202_v55, %v2202_v55 }
 0x714   : > { %v892_v57 = vsel %vm445_vm1, %v891_v56, 0.0  ;;  %v1471_v56 = vld [vmem:[%s2543_s9 + $0x60] sm:$0xff] }
 0x715   : > { %893 = vadd.xlane.f32.xlu1 %v892_v57  ;;  %v1470_v57 = vld [vmem:[%s2543_s9 + $0x58] sm:$0xff] }
 0x788   : > { %v894_v17 = vpop.xlane.xlu1 %893 }
 0x789   : > { %v895_v18 = vmul.f32 %v894_v17, %v1902_v32 }
 0x78b   : > { %v896_v20 = vadd.f32 1e-05, %v895_v18 }
 0x78d   : > { %1596 = vrsqrt.f32 %v896_v20  ;;  %vm903_vm11 = vweird.f32 %v896_v20 }
 0x793   : > { %v1597_v21 = vpop.eup %1596 }
 0x794   : > { %v898_v22 = vmul.f32 %v1597_v21, %v896_v20  ;;  %vm904_vm10 = vweird.f32 %v1597_v21  ;;  %v1490_v20 = vld [vmem:[%s2544_s10 + $0xf0] sm:$0xff] }
 0x795   : > { %vm905_vm12 = vmor %vm903_vm11, %vm904_vm10 }
 0x796   : > { %v899_v23 = vmul.f32 %v1597_v21, %v898_v22  ;;  %v1489_v22 = vld [vmem:[%s2544_s10 + $0xe8] sm:$0xff] }
 0x798   : > { %v900_v25 = vmul.f32 0.5, %v899_v23  ;;  %v1486_v23 = vld [vmem:[%s2544_s10 + $0xd0] sm:$0xff] }
 0x79a   : > { %v901_v27 = vsub.f32 1.5, %v900_v25  ;;  %v1487_v25 = vld [vmem:[%s2544_s10 + $0xd8] sm:$0xff] }
 0x79c   : > { %v902_v29 = vmul.f32 %v1597_v21, %v901_v27  ;;  %v1484_v27 = vld [vmem:[%s2544_s10 + $0xc0] sm:$0xff] }
 0x79e   : > { %v906_v31 = vsel %vm905_vm12, %v1597_v21, %v902_v29  ;;  %v1488_v21 = vld [vmem:[%s2544_s10 + $0xe0] sm:$0xff]  ;;  %v1485_v29 = vld [vmem:[%s2544_s10 + $0xc8] sm:$0xff] }
 0x79f   : > { %v907_v33 = vmul.f32 %v906_v31, %v2202_v55  ;;  %v1473_v55 = vld [vmem:[%s2543_s9 + $0x70] sm:$0xff]  ;;  %v1483_v31 = vld [vmem:[%s2544_s10 + $0xb8] sm:$0xff] }
 0x7a1   : > { %v909_v35 = vmul.f32 %v908_v30, %v907_v33  ;;  %v1482_v30 = vld [vmem:[%s2544_s10 + $0xb0] sm:$0xff]  ;;  %v1480_v33 = vld [vmem:[%s2544_s10 + $0xa0] sm:$0xff] }
 0x7a3   : > { %v911_v36 = vadd.f32 %v910_v34, %v909_v35  ;;  %v1481_v34 = vld [vmem:[%s2544_s10 + $0xa8] sm:$0xff]  ;;  %v1478_v35 = vld [vmem:[%s2544_s10 + $0x90] sm:$0xff] }
 0x7a5   : > { %1445 = vmatmul.msk.f32.vlgmr.msra.gmra.mxu0 %vm445_vm1, %v911_v36  ;;  %1454 = vmatmul.msk.f32.vlgmr.msrb.gmra.mxu1 %vm445_vm1, %v911_v36 }
 0x7ad   : > { %1463 = vmatmul.msk.f32.vlgmr.msrb.gmra.mxu0 %vm445_vm1, %v911_v36  ;;  %v1479_v36 = vld [vmem:[%s2544_s10 + $0x98] sm:$0xff] }
 0x822   : > { %v942_v39 = vpop.f32.mrf.mxu0  ;;  %v972_v40 = vpop.f32.mrf.mxu1 }
 0x823   : > { %v973_v6 = vadd.f32 %v972_v40, %v954_v37  ;;  %v943_v41 = vadd.f32 %v942_v39, %v921_v38  ;;  %v1476_v37 = vld [vmem:[%s2544_s10 + $0x80] sm:$0xff]  ;;  %v1477_v38 = vld [vmem:[%s2544_s10 + $0x88] sm:$0xff] }
 0x825   : > { %1464 = vmatpush.xpose.msk.msra.mxu1 %vm445_vm1, %v973_v6 }
 0x828   : > { %1465 = vmatmul.msk.f32.vlgmr.msra.gmra.mxu1 %vm445_vm1, %v943_v41 }
 0x829   : > { %1099 = vmatpush.msrb.mxu1 %v1474_v54  ;;  %v1512_v54 = vld [vmem:[%s2545_s11 + $0x178] sm:$0xff] }
 0x82a   : > { %v1002_v43 = vpop.f32.mrf.mxu0  ;;  %1281 = vmatpush.msra.mxu0 %v1512_v54 }
 0x82b   : > { %v1003_v44 = vadd.f32 %v1002_v43, %v984_v42  ;;  %1100 = vmatpush.msrb.mxu1 %v1473_v55  ;;  %v1528_v55 = vld [vmem:[%s2545_s11 + $0x1f8] sm:$0xff] }
 0x82d   : > { %1073 = vmatpush.msrb.mxu2 %v1003_v44 }
 0x82f   : > { %1173 = vmatpush.msra.mxu2 %v1490_v20 }
 0x831   : > { %1174 = vmatpush.msra.mxu2 %v1488_v21  ;;  %v1498_v21 = vld [vmem:[%s2545_s11 + $0x108] sm:$0xff] }
 0x833   : > { %1175 = vmatpush.msra.mxu2 %v1486_v23 }
 0x835   : > { %1176 = vmatpush.msra.mxu2 %v1484_v27  ;;  %v1497_v27 = vld [vmem:[%s2545_s11 + $0x100] sm:$0xff] }
 0x837   : > { %1177 = vmatpush.msra.mxu2 %v1482_v30 }
 0x839   : > { %1178 = vmatpush.msra.mxu2 %v1480_v33 }
 0x83b   : > { %1179 = vmatpush.msra.mxu2 %v1478_v35 }
 0x83d   : > { %1180 = vmatpush.msra.mxu2 %v1476_v37 }
 0x8a5   : > { %v1028_v45 = vpop.f32.mrf.mxu1 }
 0x8a6   : > { %v1029_v46 = vadd.f32 %v1028_v45, %v2000_v28  ;;  %v1472_v28 = vld [vmem:[%s2543_s9 + $0x68] sm:$0xff] }
 0x8a7   : > { %1101 = vmatpush.msrb.mxu1 %v1472_v28  ;;  %v1527_v28 = vld [vmem:[%s2545_s11 + $0x1f0] sm:$0xff] }
 0x8a8   : > { %v1031_v47 = vsel %vm595_vm7, %v1029_v46, -inf }
 0x8a9   : > { %1032 = vmax.xlane.f32.xlu2 %v1031_v47  ;;  %1102 = vmatpush.msrb.mxu1 %v1471_v56  ;;  %v1134_v47 = vperm.slane %v2283_v26, 6  ;;  %v1510_v56 = vld [vmem:[%s2545_s11 + $0x168] sm:$0xff] }
 0x8ab   : > { %1103 = vmatpush.msrb.mxu1 %v1470_v57  ;;  %v1526_v57 = vld [vmem:[%s2545_s11 + $0x1e8] sm:$0xff] }
 0x8ad   : > { %1104 = vmatpush.msrb.mxu1 %v1469_v62  ;;  %v1509_v62 = vld [vmem:[%s2545_s11 + $0x160] sm:$0xff] }
 0x8af   : > { %1105 = vmatpush.msrb.mxu1 %v1468_v58  ;;  %v1525_v58 = vld [vmem:[%s2545_s11 + $0x1e0] sm:$0xff] }
 0x8b1   : > { %1106 = vmatpush.msrb.mxu1 %v1467_v8  ;;  %v1502_v8 = vld [vmem:[%s2545_s11 + $0x128] sm:$0xff] }
 0x8b3   : > { %1301 = vmatpush.msra.mxu1 %v1528_v55 }
 0x8b5   : > { %1302 = vmatpush.msra.mxu1 %v1527_v28 }
 0x8b7   : > { %1303 = vmatpush.msra.mxu1 %v1526_v57 }
 0x8b9   : > { %1304 = vmatpush.msra.mxu1 %v1525_v58  ;;  %v1575_v58 = vld [vmem:[%s2538_s4 + $0x18] ss:$0 sm:$0xff] }
 0x91c   : > { %v1033_v48 = vpop.xlane.xlu2 %1032 }
 0x91d   : > { %v1034_v49 = vsub.f32 %v1029_v46, %v1033_v48 }
 0x91f   : > { %v1035_v50 = vmul.f32 1.442695, %v1034_v49 }
 0x921   : > { %1598 = vpow2.f32 %v1035_v50  ;;  %v1136_v50 = vperm.slane %v2283_v26, 7  ;;  %v1511_v26 = vld [vmem:[%s2545_s11 + $0x170] sm:$0xff] }
 0x922   : > { %1282 = vmatpush.msra.mxu0 %v1511_v26 }
 0x924   : > { %1283 = vmatpush.msra.mxu0 %v1510_v56 }
 0x926   : > { %1284 = vmatpush.msra.mxu0 %v1509_v62 }
 0x927   : > { %v1599_v52 = vpop.eup %1598 }
 0x928   : > { %v1037_v53 = vsel %vm595_vm7, %v1599_v52, 0.0 }
 0x929   : > { %1038 = vadd.xlane.f32.xlu0 %v1037_v53 }
 0x99c   : > { %v1039_v59 = vpop.xlane.xlu0 %1038 }
 0x99d   : > { %1600 = vrcp.f32 %v1039_v59  ;;  %v1051_v0 = vand.u32 2147483648, %v1039_v59  ;;  %v1049_v2 = vand.u32 2147483647, %v1039_v59  ;;  %vm1045_vm14 = vweird.f32 %v1039_v59 }
 0x99f   : > { %v1052_v4 = vor.u32 1.1754944e-38, %v1051_v0  ;;  %vm1050_vm2 = vcmp.eq.f32.partialorder %v1049_v2, 8.507059e+37  ;;  %v1506_v0 = vld [vmem:[%s2545_s11 + $0x148] sm:$0xff]  ;;  %v1505_v2 = vld [vmem:[%s2545_s11 + $0x140] sm:$0xff] }
 0x9a3   : > { %v1601_v60 = vpop.eup %1600 }
 0x9a4   : > { %v1041_v61 = vmul.f32 %v1601_v60, %v1039_v59  ;;  %vm1046_vm13 = vweird.f32 %v1601_v60  ;;  %v1508_v59 = vld [vmem:[%s2545_s11 + $0x158] sm:$0xff] }
 0x9a5   : > { %vm1047_vm15 = vmor %vm1045_vm14, %vm1046_vm13  ;;  %1285 = vmatpush.msra.mxu0 %v1508_v59 }
 0x9a6   : > { %v1042_v63 = vsub.f32 1.0, %v1041_v61  ;;  %v1507_v61 = vld [vmem:[%s2545_s11 + $0x150] sm:$0xff] }
 0x9a7   : > { %1286 = vmatpush.msra.mxu0 %v1507_v61 }
 0x9a8   : > { %v1043_v1 = vmul.f32 %v1601_v60, %v1042_v63  ;;  %v1523_v63 = vld [vmem:[%s2545_s11 + $0x1d0] sm:$0xff] }
 0x9a9   : > { %1287 = vmatpush.msra.mxu0 %v1506_v0 }
 0x9aa   : > { %v1044_v3 = vadd.f32 %v1601_v60, %v1043_v1  ;;  %v1522_v1 = vld [vmem:[%s2545_s11 + $0x1c8] sm:$0xff] }
 0x9ab   : > { %1288 = vmatpush.msra.mxu0 %v1505_v2 }
 0x9ac   : > { %v1048_v5 = vsel %vm1047_vm15, %v1601_v60, %v1044_v3  ;;  %v1524_v60 = vld [vmem:[%s2545_s11 + $0x1d8] sm:$0xff]  ;;  %v1521_v3 = vld [vmem:[%s2545_s11 + $0x1c0] sm:$0xff] }
 0x9ad   : > { %v1053_v24 = vsel %vm1050_vm2, %v1052_v4, %v1048_v5  ;;  %1305 = vmatpush.msra.mxu1 %v1524_v60  ;;  %v1504_v4 = vld [vmem:[%s2545_s11 + $0x138] sm:$0xff] }
 0x9ae   : > { %v1054_v7 = vmul.f32 %v1599_v52, %v1053_v24  ;;  %v1520_v5 = vld [vmem:[%s2545_s11 + $0x1b8] sm:$0xff]  ;;  %1289 = vmatpush.msra.mxu0 %v1504_v4  ;;  %v1503_v24 = vld [vmem:[%s2545_s11 + $0x130] sm:$0xff] }
 0x9af   : > { %1306 = vmatpush.msra.mxu1 %v1523_v63 }
 0x9b0   : > { %1466 = vmatmul.msk.f32.vlgmr.msrb.gmra.mxu2 %vm595_vm7, %v1054_v7  ;;  %v1519_v7 = vld [vmem:[%s2545_s11 + $0x1b0] sm:$0xff]  ;;  %1290 = vmatpush.msra.mxu0 %v1503_v24 }
 0x9b1   : > { %1307 = vmatpush.msra.mxu1 %v1522_v1 }
 0x9b2   : > { %1291 = vmatpush.msra.mxu0 %v1502_v8 }
 0x9b3   : > { %1308 = vmatpush.msra.mxu1 %v1521_v3 }
 0x9b5   : > { %1309 = vmatpush.msra.mxu1 %v1520_v5 }
 0x9b7   : > { %1310 = vmatpush.msra.mxu1 %v1519_v7 }
 0xa33   : > { %v1075_v9 = vpop.f32.mrf.mxu2 }
 0xa34   : > { %1475 = vmatmul.msk.f32.vlgmr.msrb.gmra.mxu1 %vm445_vm1, %v1075_v9  ;;  %v1518_v9 = vld [vmem:[%s2545_s11 + $0x1a8] sm:$0xff] }
 0xa35   : > { %1311 = vmatpush.msra.mxu1 %v1518_v9 }
 0xab1   : > { %v1108_v11 = vpop.f32.mrf.mxu1 }
 0xab2   : > { %v1109_v12 = vadd.f32 %v1108_v11, %v1087_v10  ;;  %v1492_v10 = vld [vmem:[%s2539_s5 + $0x2] sm:$0x3] }
 0xab3   : > { %v1501_v11 = vld [vmem:[%s2545_s11 + $0x120] sm:$0xff] }
 0xab4   : > { %v2327_v13 = vadd.f32 %v1109_v12, %v2196_v51  ;;  %v1491_v51 = vld [vmem:[%s2544_s10 + $0xf8] sm:$0xff]  ;;  %v1517_v12 = vld [vmem:[%s2545_s11 + $0x1a0] sm:$0xff]  ;;  %1292 = vmatpush.msra.mxu0 %v1501_v11 }
 0xab5   : > { %1193 = vmatpush.msra.mxu3 %v1491_v51  ;;  %1312 = vmatpush.msra.mxu1 %v1517_v12 }
 0xab6   : > { %v1112_v14 = vsel %vm445_vm1, %v2327_v13, 0.0 }
 0xab7   : > { %1113 = vadd.xlane.f32.xlu1 %v1112_v14  ;;  %1194 = vmatpush.msra.mxu3 %v1489_v22  ;;  %v1500_v14 = vld [vmem:[%s2545_s11 + $0x118] sm:$0xff]  ;;  %v1514_v22 = vld [vmem:[%s2545_s11 + $0x188] sm:$0xff] }
 0xab8   : > { %1293 = vmatpush.msra.mxu0 %v1500_v14 }
 0xab9   : > { %1195 = vmatpush.msra.mxu3 %v1487_v25 }
 0xabb   : > { %1196 = vmatpush.msra.mxu3 %v1485_v29  ;;  %v1513_v29 = vld [vmem:[%s2545_s11 + $0x180] sm:$0xff] }
 0xabd   : > { %1197 = vmatpush.msra.mxu3 %v1483_v31 }
 0xabf   : > { %1198 = vmatpush.msra.mxu3 %v1481_v34 }
 0xac1   : > { %1199 = vmatpush.msra.mxu3 %v1479_v36 }
 0xac3   : > { %1200 = vmatpush.msra.mxu3 %v1477_v38 }
 0xb2a   : > { %v1114_v15 = vpop.xlane.xlu1 %1113 }
 0xb2b   : > { %v1115_v16 = vmul.f32 %v1114_v15, %v1902_v32  ;;  %v1516_v15 = vld [vmem:[%s2545_s11 + $0x198] sm:$0xff] }
 0xb2c   : > { %1313 = vmatpush.msra.mxu1 %v1516_v15 }
 0xb2d   : > { %v1116_v17 = vsub.f32 %v2327_v13, %v1115_v16  ;;  %v1158_v16 = vperm.slane %v1492_v10, 0 }
 0xb2f   : > { %v1117_v18 = vmul.f32 %v1116_v17, %v1116_v17 }
 0xb31   : > { %v1118_v19 = vsel %vm445_vm1, %v1117_v18, 0.0  ;;  %v1499_v18 = vld [vmem:[%s2545_s11 + $0x110] sm:$0xff] }
 0xb32   : > { %1119 = vadd.xlane.f32.xlu2 %v1118_v19  ;;  %v1515_v19 = vld [vmem:[%s2545_s11 + $0x190] sm:$0xff]  ;;  %1294 = vmatpush.msra.mxu0 %v1499_v18 }
 0xb33   : > { %1314 = vmatpush.msra.mxu1 %v1515_v19 }
 0xb34   : > { %1295 = vmatpush.msra.mxu0 %v1498_v21 }
 0xb35   : > { %1315 = vmatpush.msra.mxu1 %v1514_v22 }
 0xb36   : > { %1296 = vmatpush.msra.mxu0 %v1497_v27 }
 0xb37   : > { %1316 = vmatpush.msra.mxu1 %v1513_v29 }
 0xba5   : > { %v1120_v39 = vpop.xlane.xlu2 %1119 }
 0xba6   : > { %v1121_v40 = vmul.f32 %v1120_v39, %v1902_v32 }
 0xba8   : > { %v1122_v6 = vadd.f32 1e-05, %v1121_v40 }
 0xbaa   : > { %1602 = vrsqrt.f32 %v1122_v6  ;;  %vm1129_vm3 = vweird.f32 %v1122_v6 }
 0xbb0   : > { %v1603_v41 = vpop.eup %1602 }
 0xbb1   : > { %v1124_v42 = vmul.f32 %v1603_v41, %v1122_v6  ;;  %vm1130_vm7 = vweird.f32 %v1603_v41 }
 0xbb2   : > { %vm1131_vm4 = vmor %vm1129_vm3, %vm1130_vm7 }
 0xbb3   : > { %v1125_v43 = vmul.f32 %v1603_v41, %v1124_v42 }
 0xbb5   : > { %v1126_v44 = vmul.f32 0.5, %v1125_v43 }
 0xbb7   : > { %v1127_v45 = vsub.f32 1.5, %v1126_v44 }
 0xbb9   : > { %v1128_v46 = vmul.f32 %v1603_v41, %v1127_v45 }
 0xbbb   : > { %v1132_v48 = vsel %vm1131_vm4, %v1603_v41, %v1128_v46 }
 0xbbc   : > { %v1133_v49 = vmul.f32 %v1132_v48, %v1116_v17  ;;  %v1159_v17 = vperm.slane %v1492_v10, 1 }
 0xbbe   : > { %v1135_v52 = vmul.f32 %v1134_v47, %v1133_v49 }
 0xbc0   : > { %v1137_v53 = vadd.f32 %v1136_v50, %v1135_v52 }
 0xbc2   : > { %1493 = vmatmul.msk.f32.vlgmr.msra.gmra.mxu2 %vm445_vm1, %v1137_v53  ;;  %1494 = vmatmul.msk.f32.vlgmr.msra.gmra.mxu3 %vm445_vm1, %v1137_v53 }
 0xc45   : > { %v1182_v20 = vpop.f32.mrf.mxu2  ;;  %v1202_v51 = vpop.f32.mrf.mxu3 }
 0xc46   : > { %v1183_v23 = vadd.f32 %v1182_v20, %v1158_v16  ;;  %v1203_v25 = vadd.f32 %v1202_v51, %v1159_v17  ;;  %v1576_v16 = vld [vmem:[%s2573_s28] ss:$0 sm:$0xff] }
 0xc48   : > { %v1495_v30 = vmul.f32 -1.702, %v1183_v23  ;;  %v1496_v31 = vmul.f32 -1.702, %v1203_v25 }
 0xc4a   : > { %v1209_v33 = vmul.f32 1.442695, %v1495_v30  ;;  %v1211_v34 = vmul.f32 1.442695, %v1496_v31 }
 0xc4c   : > { %1604 = vpow2.f32 %v1209_v33 }
 0xc4d   : > { %1606 = vpow2.f32 %v1211_v34 }
 0xc52   : > { %v1605_v35 = vpop.eup %1604 }
 0xc53   : > { %v1607_v36 = vpop.eup %1606  ;;  %v1213_v37 = vadd.f32 1.0, %v1605_v35 }
 0xc54   : > { %v1214_v38 = vadd.f32 1.0, %v1607_v36 }
 0xc55   : > { %1608 = vrcp.f32 %v1213_v37  ;;  %v1226_v43 = vand.u32 2147483648, %v1213_v37  ;;  %v1224_v46 = vand.u32 2147483647, %v1213_v37  ;;  %vm1220_vm8 = vweird.f32 %v1213_v37 }
 0xc56   : > { %1610 = vrcp.f32 %v1214_v38  ;;  %v1241_v47 = vand.u32 2147483648, %v1214_v38  ;;  %v1239_v49 = vand.u32 2147483647, %v1214_v38  ;;  %vm1235_vm10 = vweird.f32 %v1214_v38 }
 0xc57   : > { %v1227_v52 = vor.u32 1.1754944e-38, %v1226_v43  ;;  %vm1225_vm11 = vcmp.eq.f32.partialorder %v1224_v46, 8.507059e+37 }
 0xc58   : > { %v1242_v55 = vor.u32 1.1754944e-38, %v1241_v47  ;;  %vm1240_vm13 = vcmp.eq.f32.partialorder %v1239_v49, 8.507059e+37 }
 0xc5b   : > { %v1609_v39 = vpop.eup %1608 }
 0xc5c   : > { %v1611_v40 = vpop.eup %1610  ;;  %v1216_v6 = vmul.f32 %v1609_v39, %v1213_v37  ;;  %vm1221_vm5 = vweird.f32 %v1609_v39 }
 0xc5d   : > { %v1231_v41 = vmul.f32 %v1611_v40, %v1214_v38  ;;  %vm1236_vm6 = vweird.f32 %v1611_v40  ;;  %vm1222_vm9 = vmor %vm1220_vm8, %vm1221_vm5 }
 0xc5e   : > { %v1217_v42 = vsub.f32 1.0, %v1216_v6  ;;  %vm1237_vm12 = vmor %vm1235_vm10, %vm1236_vm6 }
 0xc5f   : > { %v1232_v44 = vsub.f32 1.0, %v1231_v41 }
 0xc60   : > { %v1218_v45 = vmul.f32 %v1609_v39, %v1217_v42 }
 0xc61   : > { %v1233_v48 = vmul.f32 %v1611_v40, %v1232_v44 }
 0xc62   : > { %v1219_v50 = vadd.f32 %v1609_v39, %v1218_v45 }
 0xc63   : > { %v1234_v53 = vadd.f32 %v1611_v40, %v1233_v48 }
 0xc64   : > { %v1223_v54 = vsel %vm1222_vm9, %v1609_v39, %v1219_v50 }
 0xc65   : > { %v1228_v26 = vsel %vm1225_vm11, %v1227_v52, %v1223_v54  ;;  %v1238_v28 = vsel %vm1237_vm12, %v1611_v40, %v1234_v53 }
 0xc66   : > { %v1245_v56 = vmul.f32 %v1228_v26, %v1183_v23  ;;  %v1243_v57 = vsel %vm1240_vm13, %v1242_v55, %v1238_v28 }
 0xc67   : > { %v1246_v62 = vmul.f32 %v1243_v57, %v1203_v25 }
 0xc68   : > { %1297 = vmatmul.f32.vlgmr.msra.gmra.mxu0 %v1245_v56 }
 0xc69   : > { %1317 = vmatmul.f32.vlgmr.msra.gmra.mxu1 %v1246_v62 }
 0xce5   : > { %v1298_v59 = vpop.f32.mrf.mxu0 }
 0xce6   : > { %v1299_v60 = vadd.f32 %v1575_v58, %v1298_v59  ;;  %v1318_v61 = vpop.f32.mrf.mxu1 }
 0xce8   : > { %v1319_v63 = vadd.f32 %v1318_v61, %v1299_v60 }
 0xcea   : > { %v1321_v0 = vadd.f32 %v1319_v63, %v2327_v13 }
 0xcec   : > { %v1324_v1 = vsel %vm445_vm1, %v1321_v0, 0.0 }
 0xced   : > { %1325 = vadd.xlane.f32.xlu0 %v1324_v1 }
 0xd60   : > { %v1326_v2 = vpop.xlane.xlu0 %1325 }
 0xd61   : > { %v1327_v3 = vmul.f32 %v1326_v2, %v1902_v32 }
 0xd63   : > { %v1328_v4 = vsub.f32 %v1321_v0, %v1327_v3 }
 0xd65   : > { %v1329_v5 = vmul.f32 %v1328_v4, %v1328_v4 }
 0xd67   : > { %v1330_v24 = vsel %vm445_vm1, %v1329_v5, 0.0 }
 0xd68   : > { %1331 = vadd.xlane.f32.xlu1 %v1330_v24 }
 0xddb   : > { %v1332_v7 = vpop.xlane.xlu1 %1331 }
 0xddc   : > { %v1333_v8 = vmul.f32 %v1332_v7, %v1902_v32  ;;  %v1577_v32 = vld [vmem:[%s2573_s28 + $0x1] ss:$0 sm:$0xff] }
 0xdde   : > { %v1334_v9 = vadd.f32 1e-05, %v1333_v8 }
 0xde0   : > { %1612 = vrsqrt.f32 %v1334_v9  ;;  %vm1341_vm15 = vweird.f32 %v1334_v9 }
 0xde6   : > { %v1613_v10 = vpop.eup %1612 }
 0xde7   : > { %v1336_v13 = vmul.f32 %v1613_v10, %v1334_v9  ;;  %vm1342_vm14 = vweird.f32 %v1613_v10 }
 0xde8   : > { %vm1343_vm2 = vmor %vm1341_vm15, %vm1342_vm14 }
 0xde9   : > { %v1337_v11 = vmul.f32 %v1613_v10, %v1336_v13 }
 0xdeb   : > { %v1338_v12 = vmul.f32 0.5, %v1337_v11 }
 0xded   : > { %v1339_v14 = vsub.f32 1.5, %v1338_v12 }
 0xdef   : > { %v1340_v15 = vmul.f32 %v1613_v10, %v1339_v14 }
 0xdf1   : > { %v1344_v17 = vsel %vm1343_vm2, %v1613_v10, %v1340_v15 }
 0xdf2   : > { %v1345_v18 = vmul.f32 %v1344_v17, %v1328_v4 }
 0xdf4   : > { %v1347_v19 = vmul.f32 %v1576_v16, %v1345_v18 }
 0xdf6   : > { %v1349_v20 = vadd.f32 %v1577_v32, %v1347_v19 }
 0xdf8   : > { %1350 = vst.msk [vmem:[#allocation2] sm:$0xff] %vm445_vm1, %v1349_v20 }
 0xdff   : > { %v1353_v51 = vld [vmem:[%s1352_s18] sm:$0x1] }
 0xe00   : > { %1354 = vst.msk [vmem:[%s378_s23] sm:$0x1] %vm385_vm0, %v1353_v51 }
 0xe01   : > { %1665 = shalt.err (!%p1662_p2)
}
 0xe02   : > { %1531 = dma.vmem_to_hbm [thread:$0]  (%p1822_p5), %s1367_s19, 16, %s1369_s13, %s1356_s12  }
 0xe03 PF: > { %s2577_s26 = sld [smem:[#allocation13_spill]] }
 0xe04   : > { %s2578_s21 = sld [smem:[#allocation10_spill]] }
 0xe09   : > { %p1537_p3 = scmp.ge.s32.totalorder %s2577_s26, 2 }
 0xe0a   : > { %s1380_s14 = sand.u32 1, %s2578_s21  }
 0xe0b   : > { %p1534_p4 = pnand %p1537_p3, %p1826_p6  ;;  %s1381_s0 = scalar_lea.sflag [#allocation7], %s1380_s14 }
 0xe0d   : > { %p1535_p7 = pneg %p1534_p4 }
 0xe0f   : > { %1685 = dma.done.wait (%p1535_p7), %s1381_s0, 16  }
 0xe10   : > { %1687 = vsyncadd (%p1535_p7), %s1381_s0, 4294967280  ;;  %s2580_s18 = sld [smem:[#allocation14_spill]] }
 0xe11   : > { %s2581_s16 = sld [smem:[#allocation11_spill]] }
 0xe12   : > { %s2582_s17 = sld [smem:[#allocation12_spill]] }
 0xe13   : > { %s2583_s0 = sld [smem:[#allocation15_spill]] }
 0xe16   : > { %p36_p8 = scmp.ge.s32.totalorder %s2580_s18, 4  }
 0xe18   :  { %38 = sbr.rel (!%p36_p8) target bundleno = 11 (0xb), region = 113 }
 0xe1d   :  { %1386 = vsyncpa [#allocation7], 1 }
 0xe1e   :  { %1388 = vsyncpa [#allocation7 + $0x1], 1 }

</bundles_post_ra>
